<compile_context>
chip_gen: v5e
topology: v5e:2x2
jax: 0.10.0
libtpu: 0.0.40
codegen_flags: <defaults>
</compile_context>

<pallas_src>
import functools
import math

import jax
import jax.numpy as jnp
from jax.experimental import pallas as pl
from jax.experimental.pallas import tpu as pltpu

EPS = 1e-5          # torch.nn.BatchNorm2d default eps
LANES = 128         # TPU lane width


def _round_up(x, m):
    return (x + m - 1) // m * m


def _pick_tile_h(H, W, Cp, budget_bytes=24 * 1024 * 1024):
    """Rows per H-tile, sized against the real double-buffered VMEM footprint
    (input tile + halos + x2 weights + im2col scratch + bf16 conv-out tile)."""
    Wp = W + 2
    per_row = (2 * Wp * Cp * 4       # main input tile rows (f32, double-buffered)
               + 9 * W * Cp * 2      # im2col scratch (bf16, single-buffered)
               + 2 * W * Cp * 2      # conv-out rows (bf16, double-buffered)
               + 2 * W * Cp * 4)     # f32 matmul accumulator / epilogue headroom
    fixed = (4 * Wp * Cp * 4         # two 1-row halos, double-buffered
             + 2 * 9 * Cp * Cp * 2)  # im2col weights (bf16, double-buffered)
    # TODO(synk): for very large Cp, single-buffer the constant weights
    # (pipeline_mode=pl.Buffered(1)) to reclaim VMEM on v7x.
    th = max(1, (budget_bytes - fixed) // per_row)
    th = int(min(th, H))
    if (th * W) % 8 != 0:            # keep the flattened (TH*W, Cp) stores sublane-dense
        step = 8 // math.gcd(W, 8)
        th = max(step, (th // step) * step) if H >= step else H
    return max(1, th)


# ---------------------------------------------------------------------------
# Phase 1: 3x3 conv via a single im2col matmul + per-tile BN partial stats.
# ---------------------------------------------------------------------------
def _conv_stats_kernel(xm_ref, xa_ref, xb_ref, w_ref, y_ref, st_ref, col_ref,
                       *, H, W, TH, Cp, ragged, compute_dtype):
    # --- assemble im2col (TH*W, 9*Cp) directly from main tile + 2 halo rows ---
    # window row y+dy for output row y:  rows [dy, TH) come from the main tile,
    # row TH from halo `xa`, row TH+1 from halo `xb`.
    for dy in range(3):
        for dx in range(3):
            tap = dy * 3 + dx
            c0, c1 = tap * Cp, (tap + 1) * Cp
            nm = TH - dy
            if nm > 0:
                col_ref[0:nm * W, c0:c1] = (
                    xm_ref[dy:TH, dx:dx + W, :]
                    .reshape(nm * W, Cp).astype(compute_dtype))
            if 1 <= dy <= TH:
                y0 = (TH - dy) * W
                col_ref[y0:y0 + W, c0:c1] = (
                    xa_ref[0, dx:dx + W, :].astype(compute_dtype))
            if dy == 2:
                y0 = (TH - 1) * W
                col_ref[y0:y0 + W, c0:c1] = (
                    xb_ref[0, dx:dx + W, :].astype(compute_dtype))

    # --- one MXU matmul: (TH*W, 9*Cp) x (9*Cp, Cp), f32 accumulate ---
    acc = jnp.dot(col_ref[...], w_ref[...], preferred_element_type=jnp.float32)
    y_ref[...] = acc.astype(y_ref.dtype)          # bf16 intermediate, lane/sublane dense

    # --- per-tile BN partials: sum + tile-mean-centred sum of squares ---
    if ragged:
        h = pl.program_id(1)
        valid = jnp.minimum(TH, H - h * TH)       # rows of this tile inside the image
        rows = jax.lax.broadcasted_iota(jnp.int32, (TH * W, 1), 0) // W
        mask = rows < valid
        acc_m = jnp.where(mask, acc, 0.0)
        cnt = (valid * W).astype(jnp.float32)
    else:
        acc_m = acc
        cnt = jnp.float32(TH * W)
    s = jnp.sum(acc_m, axis=0, keepdims=True)     # (1, Cp)
    mean_t = s / cnt
    d = acc - mean_t
    if ragged:
        d = jnp.where(mask, d, 0.0)
    m2 = jnp.sum(d * d, axis=0, keepdims=True)    # (1, Cp), >= 0, well conditioned
    st_ref[0:1, :] = s
    st_ref[1:2, :] = m2


# ---------------------------------------------------------------------------
# Phase 2: out = relu(conv * scale + shift) + x      (pure streaming VPU kernel)
# ---------------------------------------------------------------------------
def _bn_relu_res_kernel(y_ref, x_ref, scale_ref, shift_ref, o_ref):
    y = y_ref[...].astype(jnp.float32)
    o = jnp.maximum(y * scale_ref[...] + shift_ref[...], 0.0) + x_ref[...]
    o_ref[...] = o.astype(o_ref.dtype)


# ---------------------------------------------------------------------------
# Wrapper: NCHW in / NCHW out.
# ---------------------------------------------------------------------------
@functools.partial(jax.jit, static_argnames=("compute_dtype", "tile_h"))
def resblock_forward(x_nchw, w_oihw, b, gamma, beta, *,
                     compute_dtype=jnp.bfloat16, tile_h=None):
    N, C, H, W = x_nchw.shape
    Cout, Cin, KH, KW = w_oihw.shape
    assert Cin == C and Cout == C and KH == 3 and KW == 3
    # Conv bias added before training-mode BatchNorm cancels exactly through the mean
    # subtraction -> drop it (identical output, one less input stream + VPU pass).
    del b

    # TODO(synk): for C << 128 the lane padding wastes ~128/C of HBM bandwidth and MXU
    # work; a small-C variant should fuse W*C onto the lane axis instead.
    Cp = _round_up(C, LANES)

    TH = _pick_tile_h(H, W, Cp) if tile_h is None else int(tile_h)
    num_h = -(-H // TH)
    H_pad = num_h * TH
    ragged = (H_pad != H)
    assert (TH * W) % 8 == 0 or num_h == 1, "flattened row tile must be sublane-dense"
    HWp = H_pad * W
    Wp2 = W + 2

    # ---- layout glue (XLA): NCHW -> NHWC, lane-pad channels, spatial pad for "same".
    x_nhwc = jnp.transpose(x_nchw, (0, 2, 3, 1)).astype(jnp.float32)           # (N,H,W,C)
    xp = jnp.pad(x_nhwc, ((0, 0), (1, 1 + H_pad - H), (1, 1), (0, Cp - C)))    # (N,H_pad+2,W+2,Cp)
    # Residual stream: channel-padded but NOT spatially padded, flat (N, H_pad*W, Cp).
    x_res = jnp.pad(x_nhwc.reshape(N, H * W, C),
                    ((0, 0), (0, HWp - H * W), (0, Cp - C)))

    w_hwio = jnp.transpose(w_oihw, (2, 3, 1, 0)).astype(jnp.float32)           # (3,3,Cin,Cout)
    w_hwio = jnp.pad(w_hwio, ((0, 0), (0, 0), (0, Cp - C), (0, Cp - C)))
    w9 = w_hwio.reshape(9 * Cp, Cp).astype(compute_dtype)                      # im2col weights
    gamma_p = jnp.pad(gamma.astype(jnp.float32), (0, Cp - C))
    beta_p = jnp.pad(beta.astype(jnp.float32), (0, Cp - C))

    grid = (N, num_h)
    cparams = pltpu.CompilerParams(
        dimension_semantics=("parallel", "parallel"),
        vmem_limit_bytes=48 * 1024 * 1024,   # headroom under v7x's 64 MiB; fine on v5e/v6e
    )

    # -------------------- phase 1: im2col conv + BN partial stats --------------------
    kernel1 = functools.partial(_conv_stats_kernel, H=H, W=W, TH=TH, Cp=Cp,
                                ragged=ragged, compute_dtype=compute_dtype)
    conv_flat, stats = pl.pallas_call(
        kernel1,
        grid=grid,
        in_specs=[
            pl.BlockSpec((None, TH, Wp2, Cp), lambda n, h: (n, h, 0, 0)),              # main rows
            pl.BlockSpec((None, 1, Wp2, Cp), lambda n, h: (n, h * TH + TH, 0, 0)),     # halo row 1
            pl.BlockSpec((None, 1, Wp2, Cp), lambda n, h: (n, h * TH + TH + 1, 0, 0)), # halo row 2
            pl.BlockSpec((9 * Cp, Cp), lambda n, h: (0, 0)),                           # weights
        ],
        out_specs=[
            pl.BlockSpec((None, TH * W, Cp), lambda n, h: (n, h, 0)),                  # conv (bf16)
            pl.BlockSpec((None, 2, Cp), lambda n, h: (n * num_h + h, 0, 0)),           # (sum, m2)
        ],
        out_shape=[
            jax.ShapeDtypeStruct((N, HWp, Cp), compute_dtype),
            jax.ShapeDtypeStruct((N * num_h, 2, Cp), jnp.float32),
        ],
        scratch_shapes=[pltpu.VMEM((TH * W, 9 * Cp), compute_dtype)],                  # im2col
        compiler_params=cparams,
    )(xp, xp, xp, w9)

    # ------------- tiny glue: stable parallel-variance combine -> scale/shift --------
    valid_h = jnp.minimum(TH, H - jnp.arange(num_h) * TH).astype(jnp.float32)  # (num_h,)
    cnt = jnp.tile(valid_h * W, (N,))                       # tile index order = n*num_h + h
    total = jnp.float32(N * H * W)
    sum_t = stats[:, 0, :]                                  # (tiles, Cp)
    m2_t = stats[:, 1, :]
    mean = jnp.sum(sum_t, axis=0) / total
    mean_t = sum_t / cnt[:, None]
    m2 = jnp.sum(m2_t, axis=0) + jnp.sum(cnt[:, None] * (mean_t - mean[None, :]) ** 2, axis=0)
    var = jnp.maximum(m2 / total, 0.0)                      # biased var (training-mode BN)
    inv = jax.lax.rsqrt(var + EPS)
    scale = (gamma_p * inv).reshape(1, Cp)
    shift = (beta_p - mean * gamma_p * inv).reshape(1, Cp)

    # -------------------- phase 2: BN affine + ReLU + residual add -------------------
    out_flat = pl.pallas_call(
        _bn_relu_res_kernel,
        grid=grid,
        in_specs=[
            pl.BlockSpec((None, TH * W, Cp), lambda n, h: (n, h, 0)),   # conv tile (bf16)
            pl.BlockSpec((None, TH * W, Cp), lambda n, h: (n, h, 0)),   # residual x (f32)
            pl.BlockSpec((1, Cp), lambda n, h: (0, 0)),                 # scale
            pl.BlockSpec((1, Cp), lambda n, h: (0, 0)),                 # shift
        ],
        out_specs=pl.BlockSpec((None, TH * W, Cp), lambda n, h: (n, h, 0)),
        out_shape=jax.ShapeDtypeStruct((N, HWp, Cp), jnp.float32),
        compiler_params=cparams,
    )(conv_flat, x_res, scale, shift)

    # Crop padded rows / channels, back to NCHW at the boundary.
    out = out_flat[:, :H * W, :C].reshape(N, H, W, C)
    return jnp.transpose(out, (0, 3, 1, 2))


# ---------------------------------------------------------------------------
# Pure-JAX reference matching the PyTorch forward (training-mode BN, with bias).
# ---------------------------------------------------------------------------
def _reference(x_nchw, w_oihw, b, gamma, beta):
    conv = jax.lax.conv_general_dilated(
        x_nchw, w_oihw, window_strides=(1, 1), padding=((1, 1), (1, 1)),
        dimension_numbers=("NCHW", "OIHW", "NCHW"))
    conv = conv + b.reshape(1, -1, 1, 1)
    mean = jnp.mean(conv, axis=(0, 2, 3), keepdims=True)
    var = jnp.mean((conv - mean) ** 2, axis=(0, 2, 3), keepdims=True)
    y = (conv - mean) * jax.lax.rsqrt(var + EPS)
    y = y * gamma.reshape(1, -1, 1, 1) + beta.reshape(1, -1, 1, 1)
    y = jnp.maximum(y, 0.0)
    return y + x_nchw


if __name__ == "__main__":
    key = jax.random.PRNGKey(0)
    kx, kw, kb = jax.random.split(key, 3)

    N, C, H, W = 2, 4, 16, 16            # in_c == out_c so the residual add is valid
    x = jax.random.normal(kx, (N, C, H, W), dtype=jnp.float32)
    w = jax.random.normal(kw, (C, C, 3, 3), dtype=jnp.float32) * 0.1
    b = jax.random.normal(kb, (C,), dtype=jnp.float32) * 0.1
    gamma = jnp.ones((C,), dtype=jnp.float32)   # BatchNorm2d default weight
    beta = jnp.zeros((C,), dtype=jnp.float32)   # BatchNorm2d default bias

    ref = jax.block_until_ready(_reference(x, w, b, gamma, beta))

    # Exact-math check (f32 MXU operands), tile_h=8 so the multi-tile halo path runs.
    out32 = jax.block_until_ready(
        resblock_forward(x, w, b, gamma, beta, compute_dtype=jnp.float32, tile_h=8))
    assert out32.shape == (N, C, H, W)
    assert jnp.allclose(out32, ref, atol=1e-3, rtol=1e-3), "f32 kernel mismatch vs reference"

    # Ragged-H path: tile_h=6 pads H 16 -> 18 and exercises the masked BN statistics.
    out_rg = jax.block_until_ready(
        resblock_forward(x, w, b, gamma, beta, compute_dtype=jnp.float32, tile_h=6))
    assert jnp.allclose(out_rg, ref, atol=1e-3, rtol=1e-3), "ragged-tile kernel mismatch"

    # Performance mode: bf16 MXU operands + bf16 conv intermediate, f32 epilogue.
    out_bf = jax.block_until_ready(resblock_forward(x, w, b, gamma, beta))
    assert out_bf.shape == (N, C, H, W)
    assert jnp.allclose(out_bf, ref, atol=1e-1, rtol=1e-1), "bf16 kernel mismatch vs reference"

    print("KERNEL_OK")
</pallas_src>

<mosaic_0001>
module attributes {stable_mosaic.version = 11 : i64} {
  func.func @_conv_stats_kernel(%arg0: i32, %arg1: i32, %arg2: memref<1x8x18x128xf32, #tpu.memory_space<vmem>>, %arg3: memref<1x1x18x128xf32, #tpu.memory_space<vmem>>, %arg4: memref<1x1x18x128xf32, #tpu.memory_space<vmem>>, %arg5: memref<1152x128xf32, #tpu.memory_space<vmem>>, %arg6: memref<1x128x128xf32, #tpu.memory_space<vmem>>, %arg7: memref<1x2x128xf32, #tpu.memory_space<vmem>>, %arg8: memref<128x1152xf32, #tpu.memory_space<vmem>>) attributes {dimension_semantics = [#tpu.dimension_semantics<parallel>, #tpu.dimension_semantics<parallel>], iteration_bounds = array<i64: 2, 2>, scalar_prefetch = 0 : i64, scratch_operands = 1 : i64, tpu.core_type = #tpu.core_type<tc>, window_params = [{transform_indices = @transform_0, window_bounds = array<i64: 1, 8, 18, 128>}, {transform_indices = @transform_1, window_bounds = array<i64: 1, 1, 18, 128>}, {transform_indices = @transform_2, window_bounds = array<i64: 1, 1, 18, 128>}, {pipeline_mode = #tpu.pipeline_mode<synchronous>, transform_indices = @transform_3, window_bounds = array<i64: 1152, 128>}, {transform_indices = @transform_4, window_bounds = array<i64: 1, 128, 128>}, {transform_indices = @transform_5, window_bounds = array<i64: 1, 2, 128>}]} {
    %c0 = arith.constant 0 : index
    %c0_0 = arith.constant 0 : index
    %c0_1 = arith.constant 0 : index
    %c0_2 = arith.constant 0 : index
    %0 = vector.load %arg2[%c0, %c0_0, %c0_1, %c0_2] : memref<1x8x18x128xf32, #tpu.memory_space<vmem>>, vector<1x8x16x128xf32>
    %1 = vector.shape_cast %0 : vector<1x8x16x128xf32> to vector<8x16x128xf32>
    %2 = vector.shape_cast %1 : vector<8x16x128xf32> to vector<128x128xf32>
    %c0_3 = arith.constant 0 : index
    %c0_4 = arith.constant 0 : index
    %3 = vector.load %arg8[%c0_3, %c0_4] : memref<128x1152xf32, #tpu.memory_space<vmem>>, vector<128x128xf32>
    tpu.vector_store %arg8[%c0_3, %c0_4], %2 {strides = array<i32>} : memref<128x1152xf32, #tpu.memory_space<vmem>>, vector<128x128xf32>,
    %c0_5 = arith.constant 0 : index
    %c0_6 = arith.constant 0 : index
    %c1 = arith.constant 1 : index
    %c0_7 = arith.constant 0 : index
    %4 = vector.load %arg2[%c0_5, %c0_6, %c1, %c0_7] : memref<1x8x18x128xf32, #tpu.memory_space<vmem>>, vector<1x8x16x128xf32>
    %5 = vector.shape_cast %4 : vector<1x8x16x128xf32> to vector<8x16x128xf32>
    %6 = vector.shape_cast %5 : vector<8x16x128xf32> to vector<128x128xf32>
    %c0_8 = arith.constant 0 : index
    %c128 = arith.constant 128 : index
    %7 = vector.load %arg8[%c0_8, %c128] : memref<128x1152xf32, #tpu.memory_space<vmem>>, vector<128x128xf32>
    tpu.vector_store %arg8[%c0_8, %c128], %6 {strides = array<i32>} : memref<128x1152xf32, #tpu.memory_space<vmem>>, vector<128x128xf32>,
    %c0_9 = arith.constant 0 : index
    %c0_10 = arith.constant 0 : index
    %c2 = arith.constant 2 : index
    %c0_11 = arith.constant 0 : index
    %8 = vector.load %arg2[%c0_9, %c0_10, %c2, %c0_11] : memref<1x8x18x128xf32, #tpu.memory_space<vmem>>, vector<1x8x16x128xf32>
    %9 = vector.shape_cast %8 : vector<1x8x16x128xf32> to vector<8x16x128xf32>
    %10 = vector.shape_cast %9 : vector<8x16x128xf32> to vector<128x128xf32>
    %c0_12 = arith.constant 0 : index
    %c256 = arith.constant 256 : index
    %11 = vector.load %arg8[%c0_12, %c256] : memref<128x1152xf32, #tpu.memory_space<vmem>>, vector<128x128xf32>
    tpu.vector_store %arg8[%c0_12, %c256], %10 {strides = array<i32>} : memref<128x1152xf32, #tpu.memory_space<vmem>>, vector<128x128xf32>,
    %c0_13 = arith.constant 0 : index
    %c1_14 = arith.constant 1 : index
    %c0_15 = arith.constant 0 : index
    %c0_16 = arith.constant 0 : index
    %12 = vector.load %arg2[%c0_13, %c1_14, %c0_15, %c0_16] : memref<1x8x18x128xf32, #tpu.memory_space<vmem>>, vector<1x7x16x128xf32>
    %13 = vector.shape_cast %12 : vector<1x7x16x128xf32> to vector<7x16x128xf32>
    %14 = vector.shape_cast %13 : vector<7x16x128xf32> to vector<112x128xf32>
    %c0_17 = arith.constant 0 : index
    %c384 = arith.constant 384 : index
    %15 = vector.load %arg8[%c0_17, %c384] : memref<128x1152xf32, #tpu.memory_space<vmem>>, vector<112x128xf32>
    tpu.vector_store %arg8[%c0_17, %c384], %14 {strides = array<i32>} : memref<128x1152xf32, #tpu.memory_space<vmem>>, vector<112x128xf32>,
    %c0_18 = arith.constant 0 : index
    %c0_19 = arith.constant 0 : index
    %c0_20 = arith.constant 0 : index
    %c0_21 = arith.constant 0 : index
    %16 = vector.load %arg3[%c0_18, %c0_19, %c0_20, %c0_21] : memref<1x1x18x128xf32, #tpu.memory_space<vmem>>, vector<1x1x16x128xf32>
    %17 = vector.shape_cast %16 : vector<1x1x16x128xf32> to vector<16x128xf32>
    %c112 = arith.constant 112 : index
    %c384_22 = arith.constant 384 : index
    %18 = vector.load %arg8[%c112, %c384_22] : memref<128x1152xf32, #tpu.memory_space<vmem>>, vector<16x128xf32>
    tpu.vector_store %arg8[%c112, %c384_22], %17 {strides = array<i32>} : memref<128x1152xf32, #tpu.memory_space<vmem>>, vector<16x128xf32>,
    %c0_23 = arith.constant 0 : index
    %c1_24 = arith.constant 1 : index
    %c1_25 = arith.constant 1 : index
    %c0_26 = arith.constant 0 : index
    %19 = vector.load %arg2[%c0_23, %c1_24, %c1_25, %c0_26] : memref<1x8x18x128xf32, #tpu.memory_space<vmem>>, vector<1x7x16x128xf32>
    %20 = vector.shape_cast %19 : vector<1x7x16x128xf32> to vector<7x16x128xf32>
    %21 = vector.shape_cast %20 : vector<7x16x128xf32> to vector<112x128xf32>
    %c0_27 = arith.constant 0 : index
    %c512 = arith.constant 512 : index
    %22 = vector.load %arg8[%c0_27, %c512] : memref<128x1152xf32, #tpu.memory_space<vmem>>, vector<112x128xf32>
    tpu.vector_store %arg8[%c0_27, %c512], %21 {strides = array<i32>} : memref<128x1152xf32, #tpu.memory_space<vmem>>, vector<112x128xf32>,
    %c0_28 = arith.constant 0 : index
    %c0_29 = arith.constant 0 : index
    %c1_30 = arith.constant 1 : index
    %c0_31 = arith.constant 0 : index
    %23 = vector.load %arg3[%c0_28, %c0_29, %c1_30, %c0_31] : memref<1x1x18x128xf32, #tpu.memory_space<vmem>>, vector<1x1x16x128xf32>
    %24 = vector.shape_cast %23 : vector<1x1x16x128xf32> to vector<16x128xf32>
    %c112_32 = arith.constant 112 : index
    %c512_33 = arith.constant 512 : index
    %25 = vector.load %arg8[%c112_32, %c512_33] : memref<128x1152xf32, #tpu.memory_space<vmem>>, vector<16x128xf32>
    tpu.vector_store %arg8[%c112_32, %c512_33], %24 {strides = array<i32>} : memref<128x1152xf32, #tpu.memory_space<vmem>>, vector<16x128xf32>,
    %c0_34 = arith.constant 0 : index
    %c1_35 = arith.constant 1 : index
    %c2_36 = arith.constant 2 : index
    %c0_37 = arith.constant 0 : index
    %26 = vector.load %arg2[%c0_34, %c1_35, %c2_36, %c0_37] : memref<1x8x18x128xf32, #tpu.memory_space<vmem>>, vector<1x7x16x128xf32>
    %27 = vector.shape_cast %26 : vector<1x7x16x128xf32> to vector<7x16x128xf32>
    %28 = vector.shape_cast %27 : vector<7x16x128xf32> to vector<112x128xf32>
    %c0_38 = arith.constant 0 : index
    %c640 = arith.constant 640 : index
    %29 = vector.load %arg8[%c0_38, %c640] : memref<128x1152xf32, #tpu.memory_space<vmem>>, vector<112x128xf32>
    tpu.vector_store %arg8[%c0_38, %c640], %28 {strides = array<i32>} : memref<128x1152xf32, #tpu.memory_space<vmem>>, vector<112x128xf32>,
    %c0_39 = arith.constant 0 : index
    %c0_40 = arith.constant 0 : index
    %c2_41 = arith.constant 2 : index
    %c0_42 = arith.constant 0 : index
    %30 = vector.load %arg3[%c0_39, %c0_40, %c2_41, %c0_42] : memref<1x1x18x128xf32, #tpu.memory_space<vmem>>, vector<1x1x16x128xf32>
    %31 = vector.shape_cast %30 : vector<1x1x16x128xf32> to vector<16x128xf32>
    %c112_43 = arith.constant 112 : index
    %c640_44 = arith.constant 640 : index
    %32 = vector.load %arg8[%c112_43, %c640_44] : memref<128x1152xf32, #tpu.memory_space<vmem>>, vector<16x128xf32>
    tpu.vector_store %arg8[%c112_43, %c640_44], %31 {strides = array<i32>} : memref<128x1152xf32, #tpu.memory_space<vmem>>, vector<16x128xf32>,
    %c0_45 = arith.constant 0 : index
    %c2_46 = arith.constant 2 : index
    %c0_47 = arith.constant 0 : index
    %c0_48 = arith.constant 0 : index
    %33 = vector.load %arg2[%c0_45, %c2_46, %c0_47, %c0_48] : memref<1x8x18x128xf32, #tpu.memory_space<vmem>>, vector<1x6x16x128xf32>
    %34 = vector.shape_cast %33 : vector<1x6x16x128xf32> to vector<6x16x128xf32>
    %35 = vector.shape_cast %34 : vector<6x16x128xf32> to vector<96x128xf32>
    %c0_49 = arith.constant 0 : index
    %c768 = arith.constant 768 : index
    %36 = vector.load %arg8[%c0_49, %c768] : memref<128x1152xf32, #tpu.memory_space<vmem>>, vector<96x128xf32>
    tpu.vector_store %arg8[%c0_49, %c768], %35 {strides = array<i32>} : memref<128x1152xf32, #tpu.memory_space<vmem>>, vector<96x128xf32>,
    %c0_50 = arith.constant 0 : index
    %c0_51 = arith.constant 0 : index
    %c0_52 = arith.constant 0 : index
    %c0_53 = arith.constant 0 : index
    %37 = vector.load %arg3[%c0_50, %c0_51, %c0_52, %c0_53] : memref<1x1x18x128xf32, #tpu.memory_space<vmem>>, vector<1x1x16x128xf32>
    %38 = vector.shape_cast %37 : vector<1x1x16x128xf32> to vector<16x128xf32>
    %c96 = arith.constant 96 : index
    %c768_54 = arith.constant 768 : index
    %39 = vector.load %arg8[%c96, %c768_54] : memref<128x1152xf32, #tpu.memory_space<vmem>>, vector<16x128xf32>
    tpu.vector_store %arg8[%c96, %c768_54], %38 {strides = array<i32>} : memref<128x1152xf32, #tpu.memory_space<vmem>>, vector<16x128xf32>,
    %c0_55 = arith.constant 0 : index
    %c0_56 = arith.constant 0 : index
    %c0_57 = arith.constant 0 : index
    %c0_58 = arith.constant 0 : index
    %40 = vector.load %arg4[%c0_55, %c0_56, %c0_57, %c0_58] : memref<1x1x18x128xf32, #tpu.memory_space<vmem>>, vector<1x1x16x128xf32>
    %41 = vector.shape_cast %40 : vector<1x1x16x128xf32> to vector<16x128xf32>
    %c112_59 = arith.constant 112 : index
    %c768_60 = arith.constant 768 : index
    %42 = vector.load %arg8[%c112_59, %c768_60] : memref<128x1152xf32, #tpu.memory_space<vmem>>, vector<16x128xf32>
    tpu.vector_store %arg8[%c112_59, %c768_60], %41 {strides = array<i32>} : memref<128x1152xf32, #tpu.memory_space<vmem>>, vector<16x128xf32>,
    %c0_61 = arith.constant 0 : index
    %c2_62 = arith.constant 2 : index
    %c1_63 = arith.constant 1 : index
    %c0_64 = arith.constant 0 : index
    %43 = vector.load %arg2[%c0_61, %c2_62, %c1_63, %c0_64] : memref<1x8x18x128xf32, #tpu.memory_space<vmem>>, vector<1x6x16x128xf32>
    %44 = vector.shape_cast %43 : vector<1x6x16x128xf32> to vector<6x16x128xf32>
    %45 = vector.shape_cast %44 : vector<6x16x128xf32> to vector<96x128xf32>
    %c0_65 = arith.constant 0 : index
    %c896 = arith.constant 896 : index
    %46 = vector.load %arg8[%c0_65, %c896] : memref<128x1152xf32, #tpu.memory_space<vmem>>, vector<96x128xf32>
    tpu.vector_store %arg8[%c0_65, %c896], %45 {strides = array<i32>} : memref<128x1152xf32, #tpu.memory_space<vmem>>, vector<96x128xf32>,
    %c0_66 = arith.constant 0 : index
    %c0_67 = arith.constant 0 : index
    %c1_68 = arith.constant 1 : index
    %c0_69 = arith.constant 0 : index
    %47 = vector.load %arg3[%c0_66, %c0_67, %c1_68, %c0_69] : memref<1x1x18x128xf32, #tpu.memory_space<vmem>>, vector<1x1x16x128xf32>
    %48 = vector.shape_cast %47 : vector<1x1x16x128xf32> to vector<16x128xf32>
    %c96_70 = arith.constant 96 : index
    %c896_71 = arith.constant 896 : index
    %49 = vector.load %arg8[%c96_70, %c896_71] : memref<128x1152xf32, #tpu.memory_space<vmem>>, vector<16x128xf32>
    tpu.vector_store %arg8[%c96_70, %c896_71], %48 {strides = array<i32>} : memref<128x1152xf32, #tpu.memory_space<vmem>>, vector<16x128xf32>,
    %c0_72 = arith.constant 0 : index
    %c0_73 = arith.constant 0 : index
    %c1_74 = arith.constant 1 : index
    %c0_75 = arith.constant 0 : index
    %50 = vector.load %arg4[%c0_72, %c0_73, %c1_74, %c0_75] : memref<1x1x18x128xf32, #tpu.memory_space<vmem>>, vector<1x1x16x128xf32>
    %51 = vector.shape_cast %50 : vector<1x1x16x128xf32> to vector<16x128xf32>
    %c112_76 = arith.constant 112 : index
    %c896_77 = arith.constant 896 : index
    %52 = vector.load %arg8[%c112_76, %c896_77] : memref<128x1152xf32, #tpu.memory_space<vmem>>, vector<16x128xf32>
    tpu.vector_store %arg8[%c112_76, %c896_77], %51 {strides = array<i32>} : memref<128x1152xf32, #tpu.memory_space<vmem>>, vector<16x128xf32>,
    %c0_78 = arith.constant 0 : index
    %c2_79 = arith.constant 2 : index
    %c2_80 = arith.constant 2 : index
    %c0_81 = arith.constant 0 : index
    %53 = vector.load %arg2[%c0_78, %c2_79, %c2_80, %c0_81] : memref<1x8x18x128xf32, #tpu.memory_space<vmem>>, vector<1x6x16x128xf32>
    %54 = vector.shape_cast %53 : vector<1x6x16x128xf32> to vector<6x16x128xf32>
    %55 = vector.shape_cast %54 : vector<6x16x128xf32> to vector<96x128xf32>
    %c0_82 = arith.constant 0 : index
    %c1024 = arith.constant 1024 : index
    %56 = vector.load %arg8[%c0_82, %c1024] : memref<128x1152xf32, #tpu.memory_space<vmem>>, vector<96x128xf32>
    tpu.vector_store %arg8[%c0_82, %c1024], %55 {strides = array<i32>} : memref<128x1152xf32, #tpu.memory_space<vmem>>, vector<96x128xf32>,
    %c0_83 = arith.constant 0 : index
    %c0_84 = arith.constant 0 : index
    %c2_85 = arith.constant 2 : index
    %c0_86 = arith.constant 0 : index
    %57 = vector.load %arg3[%c0_83, %c0_84, %c2_85, %c0_86] : memref<1x1x18x128xf32, #tpu.memory_space<vmem>>, vector<1x1x16x128xf32>
    %58 = vector.shape_cast %57 : vector<1x1x16x128xf32> to vector<16x128xf32>
    %c96_87 = arith.constant 96 : index
    %c1024_88 = arith.constant 1024 : index
    %59 = vector.load %arg8[%c96_87, %c1024_88] : memref<128x1152xf32, #tpu.memory_space<vmem>>, vector<16x128xf32>
    tpu.vector_store %arg8[%c96_87, %c1024_88], %58 {strides = array<i32>} : memref<128x1152xf32, #tpu.memory_space<vmem>>, vector<16x128xf32>,
    %c0_89 = arith.constant 0 : index
    %c0_90 = arith.constant 0 : index
    %c2_91 = arith.constant 2 : index
    %c0_92 = arith.constant 0 : index
    %60 = vector.load %arg4[%c0_89, %c0_90, %c2_91, %c0_92] : memref<1x1x18x128xf32, #tpu.memory_space<vmem>>, vector<1x1x16x128xf32>
    %61 = vector.shape_cast %60 : vector<1x1x16x128xf32> to vector<16x128xf32>
    %c112_93 = arith.constant 112 : index
    %c1024_94 = arith.constant 1024 : index
    %62 = vector.load %arg8[%c112_93, %c1024_94] : memref<128x1152xf32, #tpu.memory_space<vmem>>, vector<16x128xf32>
    tpu.vector_store %arg8[%c112_93, %c1024_94], %61 {strides = array<i32>} : memref<128x1152xf32, #tpu.memory_space<vmem>>, vector<16x128xf32>,
    %c0_95 = arith.constant 0 : index
    %c0_96 = arith.constant 0 : index
    %63 = vector.load %arg8[%c0_95, %c0_96] : memref<128x1152xf32, #tpu.memory_space<vmem>>, vector<128x1152xf32>
    %c0_97 = arith.constant 0 : index
    %c0_98 = arith.constant 0 : index
    %64 = vector.load %arg5[%c0_97, %c0_98] : memref<1152x128xf32, #tpu.memory_space<vmem>>, vector<1152x128xf32>
    %cst = arith.constant dense<0.000000e+00> : vector<128x128xf32>
    %65 = tpu.matmul %63, %64, %cst {dimension_numbers = #tpu.dot_dimension_numbers<[1], [0], [0], [1], [0, 0, 1, 1], [], []>} : vector<128x1152xf32>, vector<1152x128xf32>, vector<128x128xf32> -> vector<128x128xf32>
    %c0_99 = arith.constant 0 : index
    %c0_100 = arith.constant 0 : index
    %c0_101 = arith.constant 0 : index
    %66 = vector.load %arg6[%c0_99, %c0_100, %c0_101] : memref<1x128x128xf32, #tpu.memory_space<vmem>>, vector<1x128x128xf32>
    %67 = vector.shape_cast %66 : vector<1x128x128xf32> to vector<128x128xf32>
    %68 = vector.shape_cast %65 : vector<128x128xf32> to vector<1x128x128xf32>
    tpu.vector_store %arg6[%c0_99, %c0_100, %c0_101], %68 {strides = array<i32>} : memref<1x128x128xf32, #tpu.memory_space<vmem>>, vector<1x128x128xf32>,
    %cst_102 = arith.constant dense<0.000000e+00> : vector<128xf32>
    %69 = vector.multi_reduction <add>, %65, %cst_102 [0] : vector<128x128xf32> to vector<128xf32>
    %70 = vector.shape_cast %69 : vector<128xf32> to vector<1x128xf32>
    %cst_103 = arith.constant 1.280000e+02 : f32
    %71 = vector.broadcast %cst_103 : f32 to vector<1x128xf32>
    %72 = arith.divf %70, %71 : vector<1x128xf32>
    %73 = vector.broadcast %72 : vector<1x128xf32> to vector<128x128xf32>
    %74 = arith.subf %65, %73 : vector<128x128xf32>
    %75 = arith.mulf %74, %74 : vector<128x128xf32>
    %cst_104 = arith.constant dense<0.000000e+00> : vector<128xf32>
    %76 = vector.multi_reduction <add>, %75, %cst_104 [0] : vector<128x128xf32> to vector<128xf32>
    %77 = vector.shape_cast %76 : vector<128xf32> to vector<1x128xf32>
    %c0_105 = arith.constant 0 : index
    %c0_106 = arith.constant 0 : index
    %c0_107 = arith.constant 0 : index
    %78 = vector.load %arg7[%c0_105, %c0_106, %c0_107] : memref<1x2x128xf32, #tpu.memory_space<vmem>>, vector<1x1x128xf32>
    %79 = vector.shape_cast %78 : vector<1x1x128xf32> to vector<1x128xf32>
    %80 = vector.shape_cast %70 : vector<1x128xf32> to vector<1x1x128xf32>
    tpu.vector_store %arg7[%c0_105, %c0_106, %c0_107], %80 {strides = array<i32>} : memref<1x2x128xf32, #tpu.memory_space<vmem>>, vector<1x1x128xf32>,
    %c0_108 = arith.constant 0 : index
    %c1_109 = arith.constant 1 : index
    %c0_110 = arith.constant 0 : index
    %81 = vector.load %arg7[%c0_108, %c1_109, %c0_110] : memref<1x2x128xf32, #tpu.memory_space<vmem>>, vector<1x1x128xf32>
    %82 = vector.shape_cast %81 : vector<1x1x128xf32> to vector<1x128xf32>
    %83 = vector.shape_cast %77 : vector<1x128xf32> to vector<1x1x128xf32>
    tpu.vector_store %arg7[%c0_108, %c1_109, %c0_110], %83 {strides = array<i32>} : memref<1x2x128xf32, #tpu.memory_space<vmem>>, vector<1x1x128xf32>,
    return
  }
  func.func @transform_0(%arg0: i32, %arg1: i32) -> (i32, i32, i32, i32) {
    %c0_i32 = arith.constant 0 : i32
    %c0_i32_0 = arith.constant 0 : i32
    %c0_i32_1 = arith.constant 0 : i32
    return %arg0, %arg1, %c0_i32, %c0_i32_0 : i32, i32, i32, i32
  }
  func.func @transform_1(%arg0: i32, %arg1: i32) -> (i32, i32, i32, i32) {
    %c8_i32 = arith.constant 8 : i32
    %0 = arith.muli %arg1, %c8_i32 : i32
    %c8_i32_0 = arith.constant 8 : i32
    %1 = arith.addi %0, %c8_i32_0 : i32
    %c0_i32 = arith.constant 0 : i32
    %c0_i32_1 = arith.constant 0 : i32
    %c0_i32_2 = arith.constant 0 : i32
    return %arg0, %1, %c0_i32, %c0_i32_1 : i32, i32, i32, i32
  }
  func.func @transform_2(%arg0: i32, %arg1: i32) -> (i32, i32, i32, i32) {
    %c8_i32 = arith.constant 8 : i32
    %0 = arith.muli %arg1, %c8_i32 : i32
    %c8_i32_0 = arith.constant 8 : i32
    %1 = arith.addi %0, %c8_i32_0 : i32
    %c1_i32 = arith.constant 1 : i32
    %2 = arith.addi %1, %c1_i32 : i32
    %c0_i32 = arith.constant 0 : i32
    %c0_i32_1 = arith.constant 0 : i32
    %c0_i32_2 = arith.constant 0 : i32
    return %arg0, %2, %c0_i32, %c0_i32_1 : i32, i32, i32, i32
  }
  func.func @transform_3(%arg0: i32, %arg1: i32) -> (i32, i32) {
    %c0_i32 = arith.constant 0 : i32
    %c0_i32_0 = arith.constant 0 : i32
    %c0_i32_1 = arith.constant 0 : i32
    return %c0_i32, %c0_i32_0 : i32, i32
  }
  func.func @transform_4(%arg0: i32, %arg1: i32) -> (i32, i32, i32) {
    %c0_i32 = arith.constant 0 : i32
    %c0_i32_0 = arith.constant 0 : i32
    return %arg0, %arg1, %c0_i32 : i32, i32, i32
  }
  func.func @transform_5(%arg0: i32, %arg1: i32) -> (i32, i32, i32) {
    %c2_i32 = arith.constant 2 : i32
    %0 = arith.muli %arg0, %c2_i32 : i32
    %1 = arith.addi %0, %arg1 : i32
    %c0_i32 = arith.constant 0 : i32
    %c0_i32_0 = arith.constant 0 : i32
    %c0_i32_1 = arith.constant 0 : i32
    return %1, %c0_i32, %c0_i32_0 : i32, i32, i32
  }
}

module attributes {stable_mosaic.version = 11 : i64} {
  func.func @_bn_relu_res_kernel(%arg0: i32, %arg1: i32, %arg2: memref<1x128x128xf32, #tpu.memory_space<vmem>>, %arg3: memref<1x128x128xf32, #tpu.memory_space<vmem>>, %arg4: memref<1x128xf32, #tpu.memory_space<vmem>>, %arg5: memref<1x128xf32, #tpu.memory_space<vmem>>, %arg6: memref<1x128x128xf32, #tpu.memory_space<vmem>>) attributes {dimension_semantics = [#tpu.dimension_semantics<parallel>, #tpu.dimension_semantics<parallel>], iteration_bounds = array<i64: 2, 2>, scalar_prefetch = 0 : i64, scratch_operands = 0 : i64, tpu.core_type = #tpu.core_type<tc>, window_params = [{transform_indices = @transform_0, window_bounds = array<i64: 1, 128, 128>}, {transform_indices = @transform_1, window_bounds = array<i64: 1, 128, 128>}, {pipeline_mode = #tpu.pipeline_mode<synchronous>, transform_indices = @transform_2, window_bounds = array<i64: 1, 128>}, {pipeline_mode = #tpu.pipeline_mode<synchronous>, transform_indices = @transform_3, window_bounds = array<i64: 1, 128>}, {transform_indices = @transform_4, window_bounds = array<i64: 1, 128, 128>}]} {
    %c0 = arith.constant 0 : index
    %c0_0 = arith.constant 0 : index
    %c0_1 = arith.constant 0 : index
    %0 = vector.load %arg2[%c0, %c0_0, %c0_1] : memref<1x128x128xf32, #tpu.memory_space<vmem>>, vector<1x128x128xf32>
    %1 = vector.shape_cast %0 : vector<1x128x128xf32> to vector<128x128xf32>
    %c0_2 = arith.constant 0 : index
    %c0_3 = arith.constant 0 : index
    %2 = vector.load %arg4[%c0_2, %c0_3] : memref<1x128xf32, #tpu.memory_space<vmem>>, vector<1x128xf32>
    %3 = vector.broadcast %2 : vector<1x128xf32> to vector<128x128xf32>
    %4 = arith.mulf %1, %3 : vector<128x128xf32>
    %c0_4 = arith.constant 0 : index
    %c0_5 = arith.constant 0 : index
    %5 = vector.load %arg5[%c0_4, %c0_5] : memref<1x128xf32, #tpu.memory_space<vmem>>, vector<1x128xf32>
    %6 = vector.broadcast %5 : vector<1x128xf32> to vector<128x128xf32>
    %7 = arith.addf %4, %6 : vector<128x128xf32>
    %cst = arith.constant 0.000000e+00 : f32
    %8 = vector.broadcast %cst : f32 to vector<128x128xf32>
    %9 = arith.maximumf %7, %8 : vector<128x128xf32>
    %c0_6 = arith.constant 0 : index
    %c0_7 = arith.constant 0 : index
    %c0_8 = arith.constant 0 : index
    %10 = vector.load %arg3[%c0_6, %c0_7, %c0_8] : memref<1x128x128xf32, #tpu.memory_space<vmem>>, vector<1x128x128xf32>
    %11 = vector.shape_cast %10 : vector<1x128x128xf32> to vector<128x128xf32>
    %12 = arith.addf %9, %11 : vector<128x128xf32>
    %c0_9 = arith.constant 0 : index
    %c0_10 = arith.constant 0 : index
    %c0_11 = arith.constant 0 : index
    %13 = vector.load %arg6[%c0_9, %c0_10, %c0_11] : memref<1x128x128xf32, #tpu.memory_space<vmem>>, vector<1x128x128xf32>
    %14 = vector.shape_cast %13 : vector<1x128x128xf32> to vector<128x128xf32>
    %15 = vector.shape_cast %12 : vector<128x128xf32> to vector<1x128x128xf32>
    tpu.vector_store %arg6[%c0_9, %c0_10, %c0_11], %15 {strides = array<i32>} : memref<1x128x128xf32, #tpu.memory_space<vmem>>, vector<1x128x128xf32>,
    return
  }
  func.func @transform_0(%arg0: i32, %arg1: i32) -> (i32, i32, i32) {
    %c0_i32 = arith.constant 0 : i32
    %c0_i32_0 = arith.constant 0 : i32
    return %arg0, %arg1, %c0_i32 : i32, i32, i32
  }
  func.func @transform_1(%arg0: i32, %arg1: i32) -> (i32, i32, i32) {
    %c0_i32 = arith.constant 0 : i32
    %c0_i32_0 = arith.constant 0 : i32
    return %arg0, %arg1, %c0_i32 : i32, i32, i32
  }
  func.func @transform_2(%arg0: i32, %arg1: i32) -> (i32, i32) {
    %c0_i32 = arith.constant 0 : i32
    %c0_i32_0 = arith.constant 0 : i32
    %c0_i32_1 = arith.constant 0 : i32
    return %c0_i32, %c0_i32_0 : i32, i32
  }
  func.func @transform_3(%arg0: i32, %arg1: i32) -> (i32, i32) {
    %c0_i32 = arith.constant 0 : i32
    %c0_i32_0 = arith.constant 0 : i32
    %c0_i32_1 = arith.constant 0 : i32
    return %c0_i32, %c0_i32_0 : i32, i32
  }
  func.func @transform_4(%arg0: i32, %arg1: i32) -> (i32, i32, i32) {
    %c0_i32 = arith.constant 0 : i32
    %c0_i32_0 = arith.constant 0 : i32
    return %arg0, %arg1, %c0_i32 : i32, i32, i32
  }
}

</mosaic_0001>

<bundles_post_ra>
// kernel: tile.9
= control target key start
LH: loop header
LB: loop body
LE: loop exit
PB: predicated region body
PF: predicated region fallthrough
CT: control target
= control target key end

     0   :  { %s22_s0 = inlined_call_operand.vmem [shape: f32[2], index: 0, kind: input, shape index: {}]   ;;  %s23_s1 = inlined_call_operand.vmem [shape: f32[2,2], index: 1, kind: output, shape index: {}]  }
   0x1   :  { %v4_v0 = vld [vmem:[%s22_s0] ss:$0 sm:$0xff] }
   0x2   :  { %5 = vst [vmem:[%s23_s1] sm:$0x3] %v4_v0 }

// kernel: mul.12
= control target key start
LH: loop header
LB: loop body
LE: loop exit
PB: predicated region body
PF: predicated region fallthrough
CT: control target
= control target key end

     0   :  { %vm7_vm0 = vcmask 15360   ;;  %vm13_vm1 = vcmask 31760   ;;  %s39_s0 = inlined_call_operand.vmem [shape: f32[2,2], index: 0, kind: input, shape index: {}]   ;;  %s40_s1 = inlined_call_operand.vmem [shape: f32[4], index: 1, kind: output, shape index: {}]  }
   0x1   :  { %v4_v0 = vld [vmem:[%s39_s0] sm:$0x3]  ;;  %s22_s0 = smov 2  }
   0x2   :  { %5 = vst [vmem:[#allocation1] sm:$0x3] %v4_v0 }
   0x9   :  { %v10_v1 = vld [vmem:[#allocation1 + $0x1] sm:$0x1]   ;;  %v6_v2 = vld [vmem:[#allocation1] sm:$0x1]  }
   0xa   :  { %11 = vrot.lane.b32.xlu0 %v10_v1, %s22_s0  ;;  %8 = vst.msk [vmem:[#allocation0] sm:$0x1] %vm7_vm0, %v6_v2  }
  0x7c   :  { %v12_v3 = vpop.permute.xlu0 %11  }
  0x7d   :  { %14 = vst.msk [vmem:[#allocation0] sm:$0x1] %vm13_vm1, %v12_v3  }
  0x84   :  { %v17_v4 = vld [vmem:[#allocation0] sm:$0x1] }
  0x85   :  { %20 = vst [vmem:[%s40_s1] sm:$0x1] %v17_v4 }

// kernel: resblock_forward.3
= control target key start
LH: loop header
LB: loop body
LE: loop exit
PB: predicated region body
PF: predicated region fallthrough
CT: control target
= control target key end

     0   :  { %s624_s15 = smov 0   ;;  %s626_s16 = smov 0   ;;  %s779_s0 = inlined_call_operand.vmem [shape: f32[2,256,128], index: 0, kind: input, shape index: {}]   ;;  %s780_s1 = inlined_call_operand.vmem [shape: f32[2,256,128], index: 1, kind: input, shape index: {}]   ;;  %s781_s2 = inlined_call_operand.vmem [shape: f32[1,128], index: 2, kind: input, shape index: {}]   ;;  %s782_s3 = inlined_call_operand.vmem [shape: f32[1,128], index: 3, kind: input, shape index: {}]   ;;  %s783_s4 = inlined_call_operand.vmem [shape: f32[2,256,128], index: 4, kind: output, shape index: {}]  }
   0x1   :  { %s628_s17 = smov 0   ;;  %s630_s18 = smov 0  }
   0x2   :  { %s632_s19 = smov 0  }
   0x3 LB: > { %s23_s20 = sadd.s32 1, %s589_s17  ;;  %s26_s21 = sadd.s32 1, %s593_s18  ;;  %s597_s19 = sphi %s632_s19, %s14_s19   ;;  %s593_s18 = sphi %s630_s18, %s787_s18   ;;  %s589_s17 = sphi %s628_s17, %s786_s17   ;;  %s585_s16 = sphi %s626_s16, %s785_s16   ;;  %s581_s15 = sphi %s624_s15, %s784_s15  }
   0x4   : > { %p24_p0 = scmp.ge.s32.totalorder %s23_s20, 2  ;;  %p505_p1 = scmp.ge.s32.totalorder %s597_s19, 1 }
   0x5   : > { %p200_p2 = scmp.lt.s32.totalorder %s597_s19, 5 }
   0x6   : > { %s789_s20 = smov (%p24_p0, %s23_s20), 0  ;;  %s791_s21 = smov (!%p24_p0, %s26_s21), %s593_s18 }
   0x7   : > { %p201_p3 = pnand %p505_p1, %p200_p2  ;;  %p28_p4 = scmp.ge.s32.totalorder %s791_s21, 2 }
   0x8   : > { %s506_s22 = sshll.u32 (!%p201_p3), %s581_s15, 4  ;;  %p244_p5 = scmp.lt.s32.totalorder (!%p201_p3), %s585_s16, 1 }
   0x9   : > { %s793_s21 = smov (%p28_p4, %s791_s21), 0  ;;  %204 = sbr.rel (%p201_p3) target bundleno = 44 (0x2c), region = 36 }
   0xa   : > { %p246_p6 = scmp.lt.s32.totalorder (!%p201_p3), %s506_s22, 31 }
   0xe   : > { %s795_s16 = smov (!%p244_p5, %s585_s16), 1  ;;  %s797_s22 = smov (!%p246_p6, %s506_s22), 31  ;;  %v657_v0 = vld [vmem:[%s781_s2] ss:$0 sm:$0xff] }
   0xf   : > { %s507_s23 = sshll.u32 %s795_s16, 5  ;;  %v670_v1 = vld [vmem:[%s782_s3] ss:$0 sm:$0xff] }
  0x10   : > { %s249_s24 = sadd.s32 %s507_s23, %s797_s22 }
  0x11   : > { %s659_s27 = sshll.u32 %s249_s24, 3 }
  0x12   : > { %s665_s30 = scalar_lea.vmem %s779_s0, %s659_s27  ;;  %s676_s9 = scalar_lea.vmem %s780_s1, %s659_s27 }
  0x13   : > { %v273_v2 = vld [vmem:[%s665_s30] sm:$0xff]  ;;  %v274_v3 = vld [vmem:[%s665_s30 + $0x8] sm:$0xff]  ;;  %v275_v6 = vld [vmem:[%s665_s30 + $0x10] sm:$0xff]  ;;  %s705_s12 = scalar_lea.vmem %s783_s4, %s659_s27 }
  0x14   : > { %v293_v4 = vmul.f32 %v657_v0, %v273_v2  ;;  %v294_v5 = vmul.f32 %v657_v0, %v274_v3  ;;  %v295_v7 = vmul.f32 %v657_v0, %v275_v6  ;;  %v276_v8 = vld [vmem:[%s665_s30 + $0x18] sm:$0xff]  ;;  %v277_v9 = vld [vmem:[%s665_s30 + $0x20] sm:$0xff]  ;;  %v278_v15 = vld [vmem:[%s665_s30 + $0x28] sm:$0xff] }
  0x15   : > { %v345_v11 = vld [vmem:[%s676_s9] sm:$0xff]  ;;  %v296_v13 = vmul.f32 %v657_v0, %v276_v8  ;;  %v297_v14 = vmul.f32 %v657_v0, %v277_v9  ;;  %v346_v16 = vld [vmem:[%s676_s9 + $0x8] sm:$0xff]  ;;  %v298_v18 = vmul.f32 %v657_v0, %v278_v15  ;;  %v279_v19 = vld [vmem:[%s665_s30 + $0x30] sm:$0xff] }
  0x16   : > { %v313_v10 = vadd.f32 %v670_v1, %v293_v4  ;;  %v314_v12 = vadd.f32 %v670_v1, %v294_v5  ;;  %v315_v17 = vadd.f32 %v670_v1, %v295_v7  ;;  %v280_v20 = vld [vmem:[%s665_s30 + $0x38] sm:$0xff]  ;;  %v347_v23 = vld [vmem:[%s676_s9 + $0x10] sm:$0xff]  ;;  %v349_v28 = vld [vmem:[%s676_s9 + $0x20] sm:$0xff]  ;;  %v299_v30 = vmul.f32 %v657_v0, %v279_v19 }
  0x17   : > { %v316_v24 = vadd.f32 %v670_v1, %v296_v13  ;;  %v348_v25 = vld [vmem:[%s676_s9 + $0x18] sm:$0xff]  ;;  %v317_v26 = vadd.f32 %v670_v1, %v297_v14  ;;  %v318_v29 = vadd.f32 %v670_v1, %v298_v18  ;;  %v300_v31 = vmul.f32 %v657_v0, %v280_v20  ;;  %v281_v32 = vld [vmem:[%s665_s30 + $0x40] sm:$0xff]  ;;  %v282_v33 = vld [vmem:[%s665_s30 + $0x48] sm:$0xff] }
  0x18   : > { %v329_v21 = vmax.f32 %v313_v10, 0.0  ;;  %v330_v22 = vmax.f32 %v314_v12, 0.0  ;;  %v331_v27 = vmax.f32 %v315_v17, 0.0  ;;  %v350_v38 = vld [vmem:[%s676_s9 + $0x28] sm:$0xff]  ;;  %v283_v39 = vld [vmem:[%s665_s30 + $0x50] sm:$0xff]  ;;  %v319_v42 = vadd.f32 %v670_v1, %v299_v30  ;;  %v284_v44 = vld [vmem:[%s665_s30 + $0x58] sm:$0xff] }
  0x19   : > { %v332_v36 = vmax.f32 %v316_v24, 0.0  ;;  %v333_v37 = vmax.f32 %v317_v26, 0.0  ;;  %v334_v41 = vmax.f32 %v318_v29, 0.0  ;;  %v320_v43 = vadd.f32 %v670_v1, %v300_v31  ;;  %v285_v45 = vld [vmem:[%s665_s30 + $0x60] sm:$0xff]  ;;  %v351_v48 = vld [vmem:[%s676_s9 + $0x30] sm:$0xff]  ;;  %v352_v49 = vld [vmem:[%s676_s9 + $0x38] sm:$0xff] }
  0x1a   : > { %v361_v34 = vadd.f32 %v345_v11, %v329_v21  ;;  %v362_v35 = vadd.f32 %v346_v16, %v330_v22  ;;  %v363_v40 = vadd.f32 %v347_v23, %v331_v27  ;;  %v301_v50 = vmul.f32 %v657_v0, %v281_v32  ;;  %v286_v52 = vld [vmem:[%s665_s30 + $0x68] sm:$0xff]  ;;  %v287_v61 = vld [vmem:[%s665_s30 + $0x70] sm:$0xff]  ;;  %v288_v62 = vld [vmem:[%s665_s30 + $0x78] sm:$0xff] }
  0x1b   : > { %v364_v46 = vadd.f32 %v348_v25, %v332_v36  ;;  %v365_v47 = vadd.f32 %v349_v28, %v333_v37  ;;  %v302_v51 = vmul.f32 %v657_v0, %v282_v33  ;;  %v366_v53 = vadd.f32 %v350_v38, %v334_v41  ;;  %v353_v3 = vld [vmem:[%s676_s9 + $0x40] sm:$0xff]  ;;  %v354_v4 = vld [vmem:[%s676_s9 + $0x48] sm:$0xff]  ;;  %v355_v9 = vld [vmem:[%s676_s9 + $0x50] sm:$0xff] }
  0x1c   : > { %377 = vst [vmem:[%s705_s12] sm:$0xff] %v361_v34  ;;  %v335_v54 = vmax.f32 %v319_v42, 0.0  ;;  %v336_v55 = vmax.f32 %v320_v43, 0.0  ;;  %v303_v56 = vmul.f32 %v657_v0, %v283_v39  ;;  %v321_v57 = vadd.f32 %v670_v1, %v301_v50  ;;  %v356_v13 = vld [vmem:[%s676_s9 + $0x58] sm:$0xff]  ;;  %v357_v14 = vld [vmem:[%s676_s9 + $0x60] sm:$0xff]  ;;  %v358_v22 = vld [vmem:[%s676_s9 + $0x68] sm:$0xff] }
  0x1d   : > { %378 = vst [vmem:[%s705_s12 + $0x8] sm:$0xff] %v362_v35  ;;  %v322_v58 = vadd.f32 %v670_v1, %v302_v51  ;;  %v304_v59 = vmul.f32 %v657_v0, %v284_v44  ;;  %v305_v60 = vmul.f32 %v657_v0, %v285_v45  ;;  %v306_v6 = vmul.f32 %v657_v0, %v286_v52  ;;  %v359_v28 = vld [vmem:[%s676_s9 + $0x70] sm:$0xff]  ;;  %v360_v29 = vld [vmem:[%s676_s9 + $0x78] sm:$0xff] }
  0x1e   : > { %379 = vst [vmem:[%s705_s12 + $0x10] sm:$0xff] %v363_v40  ;;  %v367_v63 = vadd.f32 %v351_v48, %v335_v54  ;;  %v368_v2 = vadd.f32 %v352_v49, %v336_v55  ;;  %v323_v5 = vadd.f32 %v670_v1, %v303_v56  ;;  %v337_v7 = vmax.f32 %v321_v57, 0.0 }
  0x1f   : > { %380 = vst [vmem:[%s705_s12 + $0x18] sm:$0xff] %v364_v46  ;;  %v338_v8 = vmax.f32 %v322_v58, 0.0  ;;  %v324_v10 = vadd.f32 %v670_v1, %v304_v59  ;;  %v325_v11 = vadd.f32 %v670_v1, %v305_v60  ;;  %v326_v15 = vadd.f32 %v670_v1, %v306_v6 }
  0x20   : > { %381 = vst [vmem:[%s705_s12 + $0x20] sm:$0xff] %v365_v47  ;;  %v339_v12 = vmax.f32 %v323_v5, 0.0  ;;  %v307_v16 = vmul.f32 %v657_v0, %v287_v61  ;;  %v308_v17 = vmul.f32 %v657_v0, %v288_v62  ;;  %v369_v18 = vadd.f32 %v353_v3, %v337_v7 }
  0x21   : > { %382 = vst [vmem:[%s705_s12 + $0x28] sm:$0xff] %v366_v53  ;;  %v370_v19 = vadd.f32 %v354_v4, %v338_v8  ;;  %v340_v20 = vmax.f32 %v324_v10, 0.0  ;;  %v341_v21 = vmax.f32 %v325_v11, 0.0  ;;  %v342_v24 = vmax.f32 %v326_v15, 0.0 }
  0x22   : > { %383 = vst [vmem:[%s705_s12 + $0x30] sm:$0xff] %v367_v63  ;;  %v371_v23 = vadd.f32 %v355_v9, %v339_v12  ;;  %v327_v25 = vadd.f32 %v670_v1, %v307_v16  ;;  %v328_v26 = vadd.f32 %v670_v1, %v308_v17 }
  0x23   : > { %384 = vst [vmem:[%s705_s12 + $0x38] sm:$0xff] %v368_v2  ;;  %v372_v0 = vadd.f32 %v356_v13, %v340_v20  ;;  %v373_v27 = vadd.f32 %v357_v14, %v341_v21  ;;  %v374_v30 = vadd.f32 %v358_v22, %v342_v24 }
  0x24   : > { %385 = vst [vmem:[%s705_s12 + $0x40] sm:$0xff] %v369_v18  ;;  %v343_v31 = vmax.f32 %v327_v25, 0.0  ;;  %v344_v32 = vmax.f32 %v328_v26, 0.0 }
  0x25   : > { %386 = vst [vmem:[%s705_s12 + $0x48] sm:$0xff] %v370_v19 }
  0x26   : > { %387 = vst [vmem:[%s705_s12 + $0x50] sm:$0xff] %v371_v23  ;;  %v375_v33 = vadd.f32 %v359_v28, %v343_v31  ;;  %v376_v34 = vadd.f32 %v360_v29, %v344_v32 }
  0x27   : > { %388 = vst [vmem:[%s705_s12 + $0x58] sm:$0xff] %v372_v0 }
  0x28   : > { %389 = vst [vmem:[%s705_s12 + $0x60] sm:$0xff] %v373_v27 }
  0x29   : > { %390 = vst [vmem:[%s705_s12 + $0x68] sm:$0xff] %v374_v30 }
  0x2a   : > { %391 = vst [vmem:[%s705_s12 + $0x70] sm:$0xff] %v375_v33 }
  0x2b   : > { %392 = vst [vmem:[%s705_s12 + $0x78] sm:$0xff] %v376_v34 }
  0x2c PF: > { %s14_s19 = sadd.s32 1, %s597_s19   ;;  %s784_s15 = smov %s589_s17 }
  0x2d   : > { %p11_p7 = scmp.ge.s32.totalorder %s14_s19, 6   ;;  %s785_s16 = smov %s593_s18 }
  0x2e   : > { %s786_s17 = smov %s789_s20  ;;  %s787_s18 = smov %s793_s21 }
  0x2f   :  { %13 = sbr.rel (!%p11_p7) target bundleno = 3 (0x3), region = 69 }

// kernel: resblock_forward.2
= control target key start
LH: loop header
LB: loop body
LE: loop exit
PB: predicated region body
PF: predicated region fallthrough
CT: control target
= control target key end

     0   :  { %s2112_s18 = smov 0   ;;  %s2114_s19 = smov 0   ;;  %s3089_s0 = inlined_call_operand.vmem [shape: f32[2,18,18,128], index: 0, kind: input, shape index: {}, may-alias: {0,1,2}]   ;;  %s3090_s1 = inlined_call_operand.vmem [shape: f32[2,18,18,128], index: 1, kind: input, shape index: {}, may-alias: {0,1,2}]   ;;  %s3091_s2 = inlined_call_operand.vmem [shape: f32[2,18,18,128], index: 2, kind: input, shape index: {}, may-alias: {0,1,2}]   ;;  %s3092_s3 = inlined_call_operand.vmem [shape: f32[1152,128], index: 3, kind: input, shape index: {}]   ;;  %s3093_s4 = inlined_call_operand.vmem [shape: f32[2,256,128], index: 4, kind: output, shape index: {0}]   ;;  %s3094_s5 = inlined_call_operand.vmem [shape: f32[4,2,128], index: 5, kind: output, shape index: {1}]  }
   0x1   :  { %s2116_s20 = smov 0   ;;  %s2118_s21 = smov 0  }
   0x2   :  { %s2120_s22 = smov 0  }
   0x3 LB: > { %s25_s23 = sadd.s32 1, %s2071_s20  ;;  %s28_s24 = sadd.s32 1, %s2075_s21  ;;  %s2079_s22 = sphi %s2120_s22, %s16_s22   ;;  %s2075_s21 = sphi %s2118_s21, %s3098_s21   ;;  %s2071_s20 = sphi %s2116_s20, %s3097_s20   ;;  %s2067_s19 = sphi %s2114_s19, %s3096_s19   ;;  %s2063_s18 = sphi %s2112_s18, %s3095_s18  }
   0x4   : > { %p26_p0 = scmp.ge.s32.totalorder %s25_s23, 2  ;;  %p1854_p1 = scmp.ge.s32.totalorder %s2079_s22, 1 }
   0x5   : > { %p274_p2 = scmp.lt.s32.totalorder %s2079_s22, 5 }
   0x6   : > { %s3100_s23 = smov (%p26_p0, %s25_s23), 0  ;;  %s3102_s24 = smov (!%p26_p0, %s28_s24), %s2075_s21 }
   0x7   : > { %p275_p3 = pnand %p1854_p1, %p274_p2  ;;  %p30_p4 = scmp.ge.s32.totalorder %s3102_s24, 2 }
   0x8   : > { %s2159_s8 = sshll.u32 (!%p275_p3), %s2063_s18, 3  ;;  %p350_p5 = scmp.lt.s32.totalorder (!%p275_p3), %s2067_s19, 1 }
   0x9   : > { %s3104_s24 = smov (%p30_p4, %s3102_s24), 0  ;;  %278 = sbr.rel (%p275_p3) target bundleno = 533 (0x215), region = 36 }
   0xa   : > { %p352_p6 = scmp.lt.s32.totalorder (!%p275_p3), %s2159_s8, 17  ;;  %s366_s26 = sadd.s32 (!%p275_p3), 8, %s2159_s8 }
   0xb   : > { %p369_p7 = scmp.lt.s32.totalorder (!%p275_p3), %s366_s26, 17  ;;  %s379_s30 = sadd.s32 (!%p275_p3), 9, %s2159_s8 }
   0xc   : > { %p382_p8 = scmp.lt.s32.totalorder (!%p275_p3), %s379_s30, 17 }
   0xe   : > { %v858_v0 = vld [vmem:[%s3092_s3 + $0x78] sm:$0xff]  ;;  %v857_v1 = vld [vmem:[%s3092_s3 + $0x70] sm:$0xff]  ;;  %v856_v2 = vld [vmem:[%s3092_s3 + $0x68] sm:$0xff]  ;;  %s2173_s15 = scalar_select %p350_p5, %s2067_s19, 1 }
   0xf   : > { %1946 = vmatpush.msra.mxu1 %v858_v0  ;;  %1947 = vmatpush.msra.mxu2 %v858_v0  ;;  %v855_v3 = vld [vmem:[%s3092_s3 + $0x60] sm:$0xff]  ;;  %v854_v4 = vld [vmem:[%s3092_s3 + $0x58] sm:$0xff]  ;;  %v853_v5 = vld [vmem:[%s3092_s3 + $0x50] sm:$0xff]  ;;  %s353_s25 = scalar_select %p352_p6, %s2159_s8, 17 }
  0x10   : > { %1948 = vmatpush.msra.mxu3 %v858_v0  ;;  %987 = vmatpush.msra.mxu0 %v858_v0  ;;  %v852_v6 = vld [vmem:[%s3092_s3 + $0x48] sm:$0xff]  ;;  %v851_v7 = vld [vmem:[%s3092_s3 + $0x40] sm:$0xff]  ;;  %v850_v8 = vld [vmem:[%s3092_s3 + $0x38] sm:$0xff]  ;;  %s2183_s28 = smul.u32 54, %s2173_s15  ;;  %s3106_s26 = smov (!%p369_p7, %s366_s26), 17 }
  0x11   : > { %1949 = vmatpush.msra.mxu1 %v857_v1  ;;  %1950 = vmatpush.msra.mxu2 %v857_v1  ;;  %v849_v9 = vld [vmem:[%s3092_s3 + $0x30] sm:$0xff]  ;;  %s1994_s6 = smul.u32 3, %s353_s25  ;;  %v848_v10 = vld [vmem:[%s3092_s3 + $0x28] sm:$0xff]  ;;  %v847_v11 = vld [vmem:[%s3092_s3 + $0x20] sm:$0xff]  ;;  %s3108_s30 = smov (!%p382_p8, %s379_s30), 17 }
  0x12   : > { %1951 = vmatpush.msra.mxu3 %v857_v1  ;;  %988 = vmatpush.msra.mxu0 %v857_v1  ;;  %v846_v12 = vld [vmem:[%s3092_s3 + $0x18] sm:$0xff]  ;;  %v845_v13 = vld [vmem:[%s3092_s3 + $0x10] sm:$0xff]  ;;  %v844_v14 = vld [vmem:[%s3092_s3 + $0x8] sm:$0xff]  ;;  %s1996_s13 = smul.u32 3, %s3106_s26 }
  0x13   : > { %1952 = vmatpush.msra.mxu1 %v856_v2  ;;  %1953 = vmatpush.msra.mxu2 %v856_v2  ;;  %s356_s12 = sadd.s32 %s2183_s28, %s1994_s6  ;;  %v843_v15 = vld [vmem:[%s3092_s3] sm:$0xff]  ;;  %v890_v18 = vld [vmem:[%s3092_s3 + $0x178] sm:$0xff]  ;;  %v889_v21 = vld [vmem:[%s3092_s3 + $0x170] sm:$0xff]  ;;  %s1997_s8 = smul.u32 3, %s3108_s30 }
  0x14   : > { %1954 = vmatpush.msra.mxu3 %v856_v2  ;;  %989 = vmatpush.msra.mxu0 %v856_v2  ;;  %s1856_s16 = sshll.u32 %s356_s12, 3  ;;  %v874_v19 = vld [vmem:[%s3092_s3 + $0xf8] sm:$0xff]  ;;  %v873_v23 = vld [vmem:[%s3092_s3 + $0xf0] sm:$0xff]  ;;  %v888_v24 = vld [vmem:[%s3092_s3 + $0x168] sm:$0xff]  ;;  %s373_s17 = sadd.s32 %s1996_s13, %s2183_s28 }
  0x15   : > { %1955 = vmatpush.msra.mxu1 %v855_v3  ;;  %1956 = vmatpush.msra.mxu2 %v855_v3  ;;  %s2207_s6 = scalar_lea.vmem %s3089_s0, %s1856_s16  ;;  %v906_v22 = vld [vmem:[%s3092_s3 + $0x1f8] sm:$0xff]  ;;  %v905_v25 = vld [vmem:[%s3092_s3 + $0x1f0] sm:$0xff]  ;;  %v872_v26 = vld [vmem:[%s3092_s3 + $0xe8] sm:$0xff]  ;;  %s1858_s25 = sshll.u32 %s373_s17, 3 }
  0x16   : > { %1957 = vmatpush.msra.mxu3 %v855_v3  ;;  %990 = vmatpush.msra.mxu0 %v855_v3  ;;  %v2213_v16 = vld [vmem:[%s2207_s6 + $0x30] sm:$0xff]  ;;  %v2216_v17 = vld [vmem:[%s2207_s6 + $0x60] sm:$0xff]  ;;  %v904_v29 = vld [vmem:[%s3092_s3 + $0x1e8] sm:$0xff]  ;;  %s2790_s29 = scalar_lea.vmem %s3090_s1, %s1858_s25  ;;  %s1862_s12 = sshll.u32 %s2173_s15, 5 }
  0x17   : > { %1958 = vmatpush.msra.mxu1 %v854_v4  ;;  %1959 = vmatpush.msra.mxu2 %v854_v4  ;;  %v2225_v20 = vld [vmem:[%s2207_s6 + $0x90] sm:$0xff]  ;;  %v409_v27 = vld [vmem:[%s2207_s6] sm:$0xff]  ;;  %v2259_v31 = vld [vmem:[%s2207_s6 + $0x68] sm:$0xff]  ;;  %s1864_s25 = sshll.u32 %s2067_s19, 1 }
  0x18   : > { %1960 = vmatpush.msra.mxu3 %v854_v4  ;;  %991 = vmatpush.msra.mxu0 %v854_v4  ;;  %v887_v28 = vld [vmem:[%s3092_s3 + $0x160] sm:$0xff]  ;;  %v2262_v32 = vld [vmem:[%s2207_s6 + $0x38] sm:$0xff]  ;;  %v885_v37 = vld [vmem:[%s3092_s3 + $0x150] sm:$0xff]  ;;  %s402_s26 = sadd.s32 %s2063_s18, %s1864_s25 }
  0x19   : > { %1961 = vmatpush.msra.mxu1 %v853_v5  ;;  %1962 = vmatpush.msra.mxu2 %v853_v5  ;;  %v871_v30 = vld [vmem:[%s3092_s3 + $0xe0] sm:$0xff]  ;;  %v886_v33 = vld [vmem:[%s3092_s3 + $0x158] sm:$0xff]  ;;  %v869_v40 = vld [vmem:[%s3092_s3 + $0xd0] sm:$0xff]  ;;  %p403_p10 = scmp.lt.s32.totalorder %s402_s26, 3 }
  0x1a   : > { %1963 = vmatpush.msra.mxu3 %v853_v5  ;;  %992 = vmatpush.msra.mxu0 %v853_v5  ;;  %v903_v34 = vld [vmem:[%s3092_s3 + $0x1e0] sm:$0xff]  ;;  %v870_v35 = vld [vmem:[%s3092_s3 + $0xd8] sm:$0xff]  ;;  %v884_v41 = vld [vmem:[%s3092_s3 + $0x148] sm:$0xff] }
  0x1b   : > { %1964 = vmatpush.msra.mxu1 %v852_v6  ;;  %1965 = vmatpush.msra.mxu2 %v852_v6  ;;  %v2275_v36 = vld [vmem:[%s2207_s6 + $0x98] sm:$0xff]  ;;  %v901_v42 = vld [vmem:[%s3092_s3 + $0x1d0] sm:$0xff]  ;;  %v868_v44 = vld [vmem:[%s3092_s3 + $0xc8] sm:$0xff]  ;;  %s3112_s26 = smov (!%p403_p10, %s402_s26), 3 }
  0x1c   : > { %1966 = vmatpush.msra.mxu3 %v852_v6  ;;  %993 = vmatpush.msra.mxu0 %v852_v6  ;;  %v902_v38 = vld [vmem:[%s3092_s3 + $0x1d8] sm:$0xff]  ;;  %v921_v43 = vld [vmem:[%s3092_s3 + $0x270] sm:$0xff]  ;;  %v883_v45 = vld [vmem:[%s3092_s3 + $0x140] sm:$0xff]  ;;  %s1865_s27 = sshll.u32 %s3112_s26, 1 }
  0x1d   : > { %1967 = vmatpush.msra.mxu1 %v851_v7  ;;  %1968 = vmatpush.msra.mxu2 %v851_v7  ;;  %v922_v39 = vld [vmem:[%s3092_s3 + $0x278] sm:$0xff]  ;;  %v900_v46 = vld [vmem:[%s3092_s3 + $0x1c8] sm:$0xff]  ;;  %v867_v48 = vld [vmem:[%s3092_s3 + $0xc0] sm:$0xff] }
  0x1e   : > { %1969 = vmatpush.msra.mxu3 %v851_v7  ;;  %994 = vmatpush.msra.mxu0 %v851_v7  ;;  %v920_v47 = vld [vmem:[%s3092_s3 + $0x268] sm:$0xff]  ;;  %v2316_v49 = vld [vmem:[%s2207_s6 + $0x78] sm:$0xff]  ;;  %v899_v52 = vld [vmem:[%s3092_s3 + $0x1c0] sm:$0xff] }
  0x1f   : > { %1970 = vmatpush.msra.mxu1 %v850_v8  ;;  %1971 = vmatpush.msra.mxu2 %v850_v8  ;;  %v2319_v50 = vld [vmem:[%s2207_s6 + $0x48] sm:$0xff]  ;;  %v882_v51 = vld [vmem:[%s3092_s3 + $0x138] sm:$0xff]  ;;  %v919_v53 = vld [vmem:[%s3092_s3 + $0x260] sm:$0xff] }
  0x20   : > { %1972 = vmatpush.msra.mxu3 %v850_v8  ;;  %995 = vmatpush.msra.mxu0 %v850_v8  ;;  %v866_v54 = vld [vmem:[%s3092_s3 + $0xb8] sm:$0xff]  ;;  %v410_v55 = vld [vmem:[%s2207_s6 + $0x8] sm:$0xff]  ;;  %v881_v57 = vld [vmem:[%s3092_s3 + $0x130] sm:$0xff] }
  0x21   : > { %1973 = vmatpush.msra.mxu1 %v849_v9  ;;  %1974 = vmatpush.msra.mxu2 %v849_v9  ;;  %v2337_v56 = vld [vmem:[%s2207_s6 + $0xa8] sm:$0xff]  ;;  %v898_v58 = vld [vmem:[%s3092_s3 + $0x1b8] sm:$0xff]  ;;  %v865_v60 = vld [vmem:[%s3092_s3 + $0xb0] sm:$0xff] }
  0x22   : > { %1975 = vmatpush.msra.mxu3 %v849_v9  ;;  %996 = vmatpush.msra.mxu0 %v849_v9  ;;  %v918_v59 = vld [vmem:[%s3092_s3 + $0x258] sm:$0xff]  ;;  %v880_v61 = vld [vmem:[%s3092_s3 + $0x128] sm:$0xff]  ;;  %v897_v62 = vld [vmem:[%s3092_s3 + $0x1b0] sm:$0xff] }
  0x23   : > { %1976 = vmatpush.msra.mxu1 %v848_v10  ;;  %1977 = vmatpush.msra.mxu2 %v848_v10  ;;  %v917_v63 = vld [vmem:[%s3092_s3 + $0x250] sm:$0xff]  ;;  %v864_v0 = vld [vmem:[%s3092_s3 + $0xa8] sm:$0xff]  ;;  %v879_v1 = vld [vmem:[%s3092_s3 + $0x120] sm:$0xff] }
  0x24   : > { %1978 = vmatpush.msra.mxu3 %v848_v10  ;;  %997 = vmatpush.msra.mxu0 %v848_v10  ;;  %v896_v2 = vld [vmem:[%s3092_s3 + $0x1a8] sm:$0xff]  ;;  %v863_v4 = vld [vmem:[%s3092_s3 + $0xa0] sm:$0xff]  ;;  %v2380_v6 = vld [vmem:[%s2207_s6 + $0x50] sm:$0xff] }
  0x25   : > { %1979 = vmatpush.msra.mxu1 %v847_v11  ;;  %1980 = vmatpush.msra.mxu2 %v847_v11  ;;  %v916_v3 = vld [vmem:[%s3092_s3 + $0x248] sm:$0xff]  ;;  %v2377_v5 = vld [vmem:[%s2207_s6 + $0x80] sm:$0xff]  ;;  %v878_v7 = vld [vmem:[%s3092_s3 + $0x118] sm:$0xff] }
  0x26   : > { %1981 = vmatpush.msra.mxu3 %v847_v11  ;;  %998 = vmatpush.msra.mxu0 %v847_v11  ;;  %v895_v8 = vld [vmem:[%s3092_s3 + $0x1a0] sm:$0xff]  ;;  %v862_v10 = vld [vmem:[%s3092_s3 + $0x98] sm:$0xff] }
  0x27   : > { %1982 = vmatpush.msra.mxu1 %v846_v12  ;;  %1983 = vmatpush.msra.mxu2 %v846_v12  ;;  %v915_v9 = vld [vmem:[%s3092_s3 + $0x240] sm:$0xff]  ;;  %v411_v11 = vld [vmem:[%s2207_s6 + $0x18] sm:$0xff] }
  0x28   : > { %1984 = vmatpush.msra.mxu3 %v846_v12  ;;  %999 = vmatpush.msra.mxu0 %v846_v12  ;;  %v2398_v12 = vld [vmem:[%s2207_s6 + $0xb0] sm:$0xff] }
  0x29   : > { %1985 = vmatpush.msra.mxu1 %v845_v13  ;;  %1986 = vmatpush.msra.mxu2 %v845_v13 }
  0x2a   : > { %1987 = vmatpush.msra.mxu3 %v845_v13  ;;  %1000 = vmatpush.msra.mxu0 %v845_v13  ;;  %v877_v13 = vld [vmem:[%s3092_s3 + $0x110] sm:$0xff] }
  0x2b   : > { %1988 = vmatpush.msra.mxu1 %v844_v14  ;;  %1989 = vmatpush.msra.mxu2 %v844_v14 }
  0x2c   : > { %1990 = vmatpush.msra.mxu3 %v844_v14  ;;  %1001 = vmatpush.msra.mxu0 %v844_v14  ;;  %v894_v14 = vld [vmem:[%s3092_s3 + $0x198] sm:$0xff] }
  0x2d   : > { %1991 = vmatpush.msra.mxu1 %v843_v15  ;;  %1992 = vmatpush.msra.mxu2 %v843_v15 }
  0x2e   : > { %1015 = vmatmul.f32.vlgmr.msra.gmra.mxu1 %v2213_v16  ;;  %1027 = vmatmul.f32.vlgmr.msra.gmra.mxu2 %v2216_v17 }
  0x2f   : > { %1117 = vmatpush.msrb.mxu2 %v890_v18  ;;  %1993 = vmatpush.msra.mxu3 %v843_v15  ;;  %v861_v18 = vld [vmem:[%s3092_s3 + $0x90] sm:$0xff] }
  0x30   : > { %1052 = vmatpush.msrb.mxu1 %v874_v19  ;;  %1039 = vmatmul.f32.vlgmr.msra.gmra.mxu3 %v2225_v20  ;;  %v876_v19 = vld [vmem:[%s3092_s3 + $0x108] sm:$0xff] }
  0x31   : > { %1118 = vmatpush.msrb.mxu2 %v889_v21  ;;  %1182 = vmatpush.msrb.mxu3 %v906_v22  ;;  %v893_v21 = vld [vmem:[%s3092_s3 + $0x190] sm:$0xff] }
  0x32   : > { %1053 = vmatpush.msrb.mxu1 %v873_v23  ;;  %1002 = vmatpush.msra.mxu0 %v843_v15  ;;  %v914_v15 = vld [vmem:[%s3092_s3 + $0x238] sm:$0xff]  ;;  %v913_v22 = vld [vmem:[%s3092_s3 + $0x230] sm:$0xff]  ;;  %v860_v23 = vld [vmem:[%s3092_s3 + $0x88] sm:$0xff] }
  0x33   : > { %1119 = vmatpush.msrb.mxu2 %v888_v24  ;;  %1183 = vmatpush.msrb.mxu3 %v905_v25  ;;  %v875_v24 = vld [vmem:[%s3092_s3 + $0x100] sm:$0xff]  ;;  %v892_v25 = vld [vmem:[%s3092_s3 + $0x188] sm:$0xff] }
  0x34   : > { %1054 = vmatpush.msrb.mxu1 %v872_v26  ;;  %1003 = vmatmul.f32.vlgmr.msra.gmra.mxu0 %v409_v27  ;;  %v912_v26 = vld [vmem:[%s3092_s3 + $0x228] sm:$0xff]  ;;  %v859_v27 = vld [vmem:[%s3092_s3 + $0x80] sm:$0xff] }
  0x35   : > { %1120 = vmatpush.msrb.mxu2 %v887_v28  ;;  %1184 = vmatpush.msrb.mxu3 %v904_v29  ;;  %v473_v28 = vld [vmem:[%s2207_s6 + $0x2] sm:$0xff] }
  0x36   : > { %1055 = vmatpush.msrb.mxu1 %v871_v30  ;;  %1030 = vmatmul.f32.gmra.mxu2 %v2259_v31  ;;  %v441_v29 = vld [vmem:[%s2207_s6 + $0x1] sm:$0xff] }
  0x37   : > { %1018 = vmatmul.f32.gmra.mxu1 %v2262_v32  ;;  %1121 = vmatpush.msrb.mxu2 %v886_v33  ;;  %v891_v30 = vld [vmem:[%s3092_s3 + $0x180] sm:$0xff] }
  0x38   : > { %1185 = vmatpush.msrb.mxu3 %v903_v34  ;;  %1056 = vmatpush.msrb.mxu1 %v870_v35  ;;  %v911_v33 = vld [vmem:[%s3092_s3 + $0x220] sm:$0xff]  ;;  %v954_v34 = vld [vmem:[%s3092_s3 + $0x378] sm:$0xff] }
  0x39   : > { %1042 = vmatmul.f32.gmra.mxu3 %v2275_v36  ;;  %1122 = vmatpush.msrb.mxu2 %v885_v37  ;;  %v412_v35 = vld [vmem:[%s2207_s6 + $0x20] sm:$0xff]  ;;  %v910_v37 = vld [vmem:[%s3092_s3 + $0x218] sm:$0xff] }
  0x3a   : > { %1186 = vmatpush.msrb.mxu3 %v902_v38  ;;  %1247 = vmatpush.msrb.mxu0 %v922_v39  ;;  %v970_v38 = vld [vmem:[%s3092_s3 + $0x3f8] sm:$0xff] }
  0x3b   : > { %1057 = vmatpush.msrb.mxu1 %v869_v40  ;;  %1123 = vmatpush.msrb.mxu2 %v884_v41  ;;  %v938_v39 = vld [vmem:[%s3092_s3 + $0x2f8] sm:$0xff]  ;;  %v953_v40 = vld [vmem:[%s3092_s3 + $0x370] sm:$0xff] }
  0x3c   : > { %1187 = vmatpush.msrb.mxu3 %v901_v42  ;;  %1248 = vmatpush.msrb.mxu0 %v921_v43  ;;  %v909_v41 = vld [vmem:[%s3092_s3 + $0x210] sm:$0xff] }
  0x3d   : > { %1058 = vmatpush.msrb.mxu1 %v868_v44  ;;  %1124 = vmatpush.msrb.mxu2 %v883_v45  ;;  %v969_v42 = vld [vmem:[%s3092_s3 + $0x3f0] sm:$0xff]  ;;  %v952_v44 = vld [vmem:[%s3092_s3 + $0x368] sm:$0xff] }
  0x3e   : > { %1188 = vmatpush.msrb.mxu3 %v900_v46  ;;  %1249 = vmatpush.msrb.mxu0 %v920_v47  ;;  %v937_v43 = vld [vmem:[%s3092_s3 + $0x2f0] sm:$0xff]  ;;  %v908_v45 = vld [vmem:[%s3092_s3 + $0x208] sm:$0xff] }
  0x3f   : > { %1059 = vmatpush.msrb.mxu1 %v867_v48  ;;  %1033 = vmatmul.f32.gmra.mxu2 %v2316_v49  ;;  %v474_v46 = vld [vmem:[%s2207_s6 + $0xa] sm:$0xff] }
  0x40   : > { %1021 = vmatmul.f32.gmra.mxu1 %v2319_v50  ;;  %1125 = vmatpush.msrb.mxu2 %v882_v51  ;;  %v442_v47 = vld [vmem:[%s2207_s6 + $0x9] sm:$0xff]  ;;  %v907_v51 = vld [vmem:[%s3092_s3 + $0x200] sm:$0xff] }
  0x41   : > { %1189 = vmatpush.msrb.mxu3 %v899_v52  ;;  %1250 = vmatpush.msrb.mxu0 %v919_v53  ;;  %v968_v48 = vld [vmem:[%s3092_s3 + $0x3e8] sm:$0xff]  ;;  %v1880_v53 = vld [vmem:[%s2207_s6 + $0x19] sm:$0xff] }
  0x42   : > { %1060 = vmatpush.msrb.mxu1 %v866_v54  ;;  %1006 = vmatmul.f32.gmra.mxu0 %v410_v55  ;;  %v936_v52 = vld [vmem:[%s3092_s3 + $0x2e8] sm:$0xff]  ;;  %v986_v54 = vld [vmem:[%s3092_s3 + $0x478] sm:$0xff]  ;;  %v951_v55 = vld [vmem:[%s3092_s3 + $0x360] sm:$0xff] }
  0x43   : > { %1045 = vmatmul.f32.gmra.mxu3 %v2337_v56  ;;  %1126 = vmatpush.msrb.mxu2 %v881_v57  ;;  %v967_v57 = vld [vmem:[%s3092_s3 + $0x3e0] sm:$0xff] }
  0x44   : > { %1190 = vmatpush.msrb.mxu3 %v898_v58  ;;  %1251 = vmatpush.msrb.mxu0 %v918_v59  ;;  %v935_v58 = vld [vmem:[%s3092_s3 + $0x2e0] sm:$0xff]  ;;  %v985_v59 = vld [vmem:[%s3092_s3 + $0x470] sm:$0xff] }
  0x45   : > { %1061 = vmatpush.msrb.mxu1 %v865_v60  ;;  %1127 = vmatpush.msrb.mxu2 %v880_v61  ;;  %v950_v60 = vld [vmem:[%s3092_s3 + $0x358] sm:$0xff] }
  0x46   : > { %1191 = vmatpush.msrb.mxu3 %v897_v62  ;;  %1252 = vmatpush.msrb.mxu0 %v917_v63  ;;  %v966_v61 = vld [vmem:[%s3092_s3 + $0x3d8] sm:$0xff] }
  0x47   : > { %1062 = vmatpush.msrb.mxu1 %v864_v0  ;;  %1128 = vmatpush.msrb.mxu2 %v879_v1  ;;  %v934_v62 = vld [vmem:[%s3092_s3 + $0x2d8] sm:$0xff]  ;;  %v984_v0 = vld [vmem:[%s3092_s3 + $0x468] sm:$0xff]  ;;  %v949_v1 = vld [vmem:[%s3092_s3 + $0x350] sm:$0xff] }
  0x48   : > { %1192 = vmatpush.msrb.mxu3 %v896_v2  ;;  %1253 = vmatpush.msrb.mxu0 %v916_v3  ;;  %v2513_v63 = vld [vmem:[%s2207_s6 + $0x1a] sm:$0xff]  ;;  %v965_v3 = vld [vmem:[%s3092_s3 + $0x3d0] sm:$0xff] }
  0x49   : > { %1063 = vmatpush.msrb.mxu1 %v863_v4  ;;  %1036 = vmatmul.f32.gmra.mxu2 %v2377_v5  ;;  %v983_v2 = vld [vmem:[%s3092_s3 + $0x460] sm:$0xff] }
  0x4a   : > { %1024 = vmatmul.f32.gmra.mxu1 %v2380_v6  ;;  %1129 = vmatpush.msrb.mxu2 %v878_v7  ;;  %v1881_v4 = vld [vmem:[%s2207_s6 + $0x21] sm:$0xff]  ;;  %v982_v7 = vld [vmem:[%s3092_s3 + $0x458] sm:$0xff] }
  0x4b   : > { %1193 = vmatpush.msrb.mxu3 %v895_v8  ;;  %1254 = vmatpush.msrb.mxu0 %v915_v9  ;;  %v933_v8 = vld [vmem:[%s3092_s3 + $0x2d0] sm:$0xff]  ;;  %v948_v9 = vld [vmem:[%s3092_s3 + $0x348] sm:$0xff] }
  0x4c   : > { %1064 = vmatpush.msrb.mxu1 %v862_v10  ;;  %1009 = vmatmul.f32.gmra.mxu0 %v411_v11  ;;  %v964_v10 = vld [vmem:[%s3092_s3 + $0x3c8] sm:$0xff] }
  0x4d   : > { %1048 = vmatmul.f32.gmra.mxu3 %v2398_v12  ;;  %1130 = vmatpush.msrb.mxu2 %v877_v13  ;;  %v932_v13 = vld [vmem:[%s3092_s3 + $0x2c8] sm:$0xff] }
  0x4e   : > { %1194 = vmatpush.msrb.mxu3 %v894_v14  ;;  %1255 = vmatpush.msrb.mxu0 %v914_v15  ;;  %v2549_v14 = vld [vmem:[%s2207_s6 + $0x22] sm:$0xff]  ;;  %v2553_v15 = vld [vmem:[%s2207_s6 + $0x31] sm:$0xff] }
  0x4f   : > { %1065 = vmatpush.msrb.mxu1 %v861_v18  ;;  %1131 = vmatpush.msrb.mxu2 %v876_v19  ;;  %v947_v18 = vld [vmem:[%s3092_s3 + $0x340] sm:$0xff] }
  0x50   : > { %1195 = vmatpush.msrb.mxu3 %v893_v21  ;;  %1256 = vmatpush.msrb.mxu0 %v913_v22  ;;  %v963_v19 = vld [vmem:[%s3092_s3 + $0x3c0] sm:$0xff]  ;;  %v980_v21 = vld [vmem:[%s3092_s3 + $0x448] sm:$0xff] }
  0x51   : > { %1066 = vmatpush.msrb.mxu1 %v860_v23  ;;  %1132 = vmatpush.msrb.mxu2 %v875_v24  ;;  %v931_v22 = vld [vmem:[%s3092_s3 + $0x2c0] sm:$0xff]  ;;  %v2570_v23 = vld [vmem:[%s2207_s6 + $0x32] sm:$0xff] }
  0x52   : > { %1196 = vmatpush.msrb.mxu3 %v892_v25  ;;  %1257 = vmatpush.msrb.mxu0 %v912_v26  ;;  %v2574_v24 = vld [vmem:[%s2207_s6 + $0x39] sm:$0xff] }
  0x53   : > { %1067 = vmatpush.msrb.mxu1 %v859_v27  ;;  %1133 = vmatmul.f32.vlgmr.msrb.gmra.mxu2 %v473_v28  ;;  %v946_v25 = vld [vmem:[%s3092_s3 + $0x338] sm:$0xff]  ;;  %v979_v27 = vld [vmem:[%s3092_s3 + $0x440] sm:$0xff] }
  0x54   : > { %1068 = vmatmul.f32.vlgmr.msrb.gmra.mxu1 %v441_v29  ;;  %1197 = vmatpush.msrb.mxu3 %v891_v30  ;;  %v962_v26 = vld [vmem:[%s3092_s3 + $0x3b8] sm:$0xff]  ;;  %v2596_v30 = vld [vmem:[%s2207_s6 + $0x49] sm:$0xff] }
  0x55   : > { %1258 = vmatpush.msrb.mxu0 %v911_v33  ;;  %1377 = vmatpush.msra.mxu2 %v954_v34  ;;  %v930_v28 = vld [vmem:[%s3092_s3 + $0x2b8] sm:$0xff]  ;;  %v945_v33 = vld [vmem:[%s3092_s3 + $0x330] sm:$0xff] }
  0x56   : > { %1012 = vmatmul.f32.gmra.mxu0 %v412_v35  ;;  %1198 = vmatmul.f32.vlgmr.msrb.gmra.mxu3 %v411_v11  ;;  %v981_v11 = vld [vmem:[%s3092_s3 + $0x450] sm:$0xff]  ;;  %v2592_v29 = vld [vmem:[%s2207_s6 + $0x3a] sm:$0xff] }
  0x57   : > { %1259 = vmatpush.msrb.mxu0 %v910_v37  ;;  %1442 = vmatpush.msra.mxu3 %v970_v38  ;;  %v961_v34 = vld [vmem:[%s3092_s3 + $0x3b0] sm:$0xff] }
  0x58   : > { %1312 = vmatpush.msra.mxu1 %v938_v39  ;;  %1378 = vmatpush.msra.mxu2 %v953_v40  ;;  %v929_v37 = vld [vmem:[%s3092_s3 + $0x2b0] sm:$0xff]  ;;  %v944_v40 = vld [vmem:[%s3092_s3 + $0x328] sm:$0xff] }
  0x59   : > { %1260 = vmatpush.msrb.mxu0 %v909_v41  ;;  %1443 = vmatpush.msra.mxu3 %v969_v42  ;;  %v2614_v38 = vld [vmem:[%s2207_s6 + $0x4a] sm:$0xff] }
  0x5a   : > { %1313 = vmatpush.msra.mxu1 %v937_v43  ;;  %1379 = vmatpush.msra.mxu2 %v952_v44  ;;  %v2618_v39 = vld [vmem:[%s2207_s6 + $0x51] sm:$0xff]  ;;  %v960_v41 = vld [vmem:[%s3092_s3 + $0x3a8] sm:$0xff] }
  0x5b   : > { %1261 = vmatpush.msrb.mxu0 %v908_v45  ;;  %1136 = vmatmul.f32.gmra.mxu2 %v474_v46  ;;  %v977_v42 = vld [vmem:[%s3092_s3 + $0x430] sm:$0xff]  ;;  %v928_v43 = vld [vmem:[%s3092_s3 + $0x2a8] sm:$0xff]  ;;  %v943_v46 = vld [vmem:[%s3092_s3 + $0x320] sm:$0xff] }
  0x5c   : > { %1071 = vmatmul.f32.gmra.mxu1 %v442_v47  ;;  %1444 = vmatpush.msra.mxu3 %v968_v48  ;;  %v2636_v44 = vld [vmem:[%s2207_s6 + $0x52] sm:$0xff]  ;;  %v2640_v45 = vld [vmem:[%s2207_s6 + $0x61] sm:$0xff] }
  0x5d   : > { %1262 = vmatpush.msrb.mxu0 %v907_v51  ;;  %1314 = vmatpush.msra.mxu1 %v936_v52  ;;  %v959_v47 = vld [vmem:[%s3092_s3 + $0x3a0] sm:$0xff]  ;;  %v976_v48 = vld [vmem:[%s3092_s3 + $0x428] sm:$0xff] }
  0x5e   : > { %1201 = vmatmul.f32.gmra.mxu3 %v412_v35  ;;  %1263 = vmatmul.f32.vlgmr.msrb.gmra.mxu0 %v1880_v53  ;;  %v978_v35 = vld [vmem:[%s3092_s3 + $0x438] sm:$0xff]  ;;  %v927_v51 = vld [vmem:[%s3092_s3 + $0x2a0] sm:$0xff] }
  0x5f   : > { %1507 = vmatpush.msra.mxu0 %v986_v54  ;;  %1380 = vmatpush.msra.mxu2 %v951_v55  ;;  %v2658_v52 = vld [vmem:[%s2207_s6 + $0x62] sm:$0xff]  ;;  %v942_v54 = vld [vmem:[%s3092_s3 + $0x318] sm:$0xff] }
  0x60   : > { %1445 = vmatpush.msra.mxu3 %v967_v57  ;;  %1315 = vmatpush.msra.mxu1 %v935_v58  ;;  %v958_v55 = vld [vmem:[%s3092_s3 + $0x398] sm:$0xff]  ;;  %v975_v57 = vld [vmem:[%s3092_s3 + $0x420] sm:$0xff] }
  0x61   : > { %1508 = vmatpush.msra.mxu0 %v985_v59  ;;  %1381 = vmatpush.msra.mxu2 %v950_v60  ;;  %v926_v58 = vld [vmem:[%s3092_s3 + $0x298] sm:$0xff]  ;;  %v2680_v59 = vld [vmem:[%s2207_s6 + $0x6a] sm:$0xff] }
  0x62   : > { %1446 = vmatpush.msra.mxu3 %v966_v61  ;;  %1316 = vmatpush.msra.mxu1 %v934_v62  ;;  %v2684_v60 = vld [vmem:[%s2207_s6 + $0x79] sm:$0xff]  ;;  %v941_v61 = vld [vmem:[%s3092_s3 + $0x310] sm:$0xff] }
  0x63   : > { %1139 = vmatmul.f32.gmra.mxu2 %v2513_v63  ;;  %1509 = vmatpush.msra.mxu0 %v984_v0  ;;  %v957_v62 = vld [vmem:[%s3092_s3 + $0x390] sm:$0xff]  ;;  %v974_v0 = vld [vmem:[%s3092_s3 + $0x418] sm:$0xff] }
  0x64   : > { %1074 = vmatmul.f32.gmra.mxu1 %v1880_v53  ;;  %1382 = vmatpush.msra.mxu2 %v949_v1  ;;  %v2662_v53 = vld [vmem:[%s2207_s6 + $0x69] sm:$0xff] }
  0x65   : > { %1510 = vmatpush.msra.mxu0 %v983_v2  ;;  %1447 = vmatpush.msra.mxu3 %v965_v3  ;;  %v925_v1 = vld [vmem:[%s3092_s3 + $0x290] sm:$0xff]  ;;  %v2702_v2 = vld [vmem:[%s2207_s6 + $0x7a] sm:$0xff] }
  0x66   : > { %1204 = vmatmul.f32.gmra.mxu3 %v2213_v16  ;;  %1266 = vmatmul.f32.gmra.mxu0 %v1881_v4  ;;  %v2706_v3 = vld [vmem:[%s2207_s6 + $0x81] sm:$0xff] }
  0x67   : > { %1511 = vmatpush.msra.mxu0 %v982_v7  ;;  %1317 = vmatpush.msra.mxu1 %v933_v8  ;;  %v956_v7 = vld [vmem:[%s3092_s3 + $0x388] sm:$0xff]  ;;  %v973_v8 = vld [vmem:[%s3092_s3 + $0x410] sm:$0xff] }
  0x68   : > { %1383 = vmatpush.msra.mxu2 %v948_v9  ;;  %1448 = vmatpush.msra.mxu3 %v964_v10  ;;  %v924_v9 = vld [vmem:[%s3092_s3 + $0x288] sm:$0xff] }
  0x69   : > { %1512 = vmatpush.msra.mxu0 %v981_v11  ;;  %1318 = vmatpush.msra.mxu1 %v932_v13  ;;  %v2724_v10 = vld [vmem:[%s2207_s6 + $0x82] sm:$0xff] }
  0x6a   : > { %1384 = vmatpush.msra.mxu2 %v947_v18  ;;  %1449 = vmatpush.msra.mxu3 %v963_v19  ;;  %v939_v13 = vld [vmem:[%s3092_s3 + $0x300] sm:$0xff]  ;;  %v972_v19 = vld [vmem:[%s3092_s3 + $0x408] sm:$0xff] }
  0x6b   : > { %1142 = vmatmul.f32.gmra.mxu2 %v2549_v14  ;;  %1513 = vmatpush.msra.mxu0 %v980_v21  ;;  %v955_v18 = vld [vmem:[%s3092_s3 + $0x380] sm:$0xff] }
  0x6c   : > { %1077 = vmatmul.f32.gmra.mxu1 %v1881_v4  ;;  %1385 = vmatpush.msra.mxu2 %v946_v25  ;;  %v940_v4 = vld [vmem:[%s3092_s3 + $0x308] sm:$0xff]  ;;  %v923_v21 = vld [vmem:[%s3092_s3 + $0x280] sm:$0xff] }
  0x6d   : > { %1319 = vmatpush.msra.mxu1 %v931_v22  ;;  %1450 = vmatpush.msra.mxu3 %v962_v26  ;;  %v2749_v22 = vld [vmem:[%s2207_s6 + $0x92] sm:$0xff] }
  0x6e   : > { %1207 = vmatmul.f32.gmra.mxu3 %v2262_v32  ;;  %1269 = vmatmul.f32.gmra.mxu0 %v2553_v15  ;;  %v2755_v25 = vld [vmem:[%s2207_s6 + $0x99] sm:$0xff] }
  0x6f   : > { %1514 = vmatpush.msra.mxu0 %v979_v27  ;;  %1320 = vmatpush.msra.mxu1 %v930_v28 }
  0x70   : > { %1386 = vmatpush.msra.mxu2 %v945_v33  ;;  %1451 = vmatpush.msra.mxu3 %v961_v34  ;;  %v971_v33 = vld [vmem:[%s3092_s3 + $0x400] sm:$0xff] }
  0x71   : > { %1515 = vmatpush.msra.mxu0 %v978_v35  ;;  %1321 = vmatpush.msra.mxu1 %v929_v37  ;;  %v2768_v34 = vld [vmem:[%s2207_s6 + $0x9a] sm:$0xff]  ;;  %v2775_v37 = vld [vmem:[%s2207_s6 + $0xa9] sm:$0xff] }
  0x72   : > { %1387 = vmatpush.msra.mxu2 %v944_v40  ;;  %1452 = vmatpush.msra.mxu3 %v960_v41 }
  0x73   : > { %1145 = vmatmul.f32.gmra.mxu2 %v2570_v23  ;;  %1516 = vmatpush.msra.mxu0 %v977_v42  ;;  %v2785_v42 = vld [vmem:[%s2207_s6 + $0xaa] sm:$0xff] }
  0x74   : > { %1080 = vmatmul.f32.gmra.mxu1 %v2553_v15  ;;  %1388 = vmatpush.msra.mxu2 %v943_v46  ;;  %v2796_v46 = vld [vmem:[%s2790_s29] sm:$0xff] }
  0x75   : > { %1322 = vmatpush.msra.mxu1 %v928_v43  ;;  %1453 = vmatpush.msra.mxu3 %v959_v47  ;;  %v2799_v47 = vld [vmem:[%s2207_s6 + $0xb1] sm:$0xff] }
  0x76   : > { %1210 = vmatmul.f32.gmra.mxu3 %v2319_v50  ;;  %1272 = vmatmul.f32.gmra.mxu0 %v2574_v24 }
  0x77   : > { %1517 = vmatpush.msra.mxu0 %v976_v48  ;;  %1323 = vmatpush.msra.mxu1 %v927_v51 }
  0x78   : > { %1389 = vmatpush.msra.mxu2 %v942_v54  ;;  %1454 = vmatpush.msra.mxu3 %v958_v55  ;;  %v2809_v54 = vld [vmem:[%s2207_s6 + $0xb2] sm:$0xff] }
  0x79   : > { %1518 = vmatpush.msra.mxu0 %v975_v57  ;;  %1324 = vmatpush.msra.mxu1 %v926_v58  ;;  %v2813_v57 = vld [vmem:[%s2790_s29 + $0x8] sm:$0xff] }
  0x7a   : > { %1390 = vmatpush.msra.mxu2 %v941_v61  ;;  %1455 = vmatpush.msra.mxu3 %v957_v62  ;;  %v2816_v58 = vld [vmem:[%s2790_s29 + $0x1] sm:$0xff] }
  0x7b   : > { %1148 = vmatmul.f32.gmra.mxu2 %v2592_v29  ;;  %1519 = vmatpush.msra.mxu0 %v974_v0 }
  0x7c   : > { %1083 = vmatmul.f32.gmra.mxu1 %v2574_v24  ;;  %1391 = vmatpush.msra.mxu2 %v940_v4  ;;  %v2827_v4 = vld [vmem:[%s2790_s29 + $0x9] sm:$0xff] }
  0x7d   : > { %1325 = vmatpush.msra.mxu1 %v925_v1  ;;  %1456 = vmatpush.msra.mxu3 %v956_v7 }
  0x7e   : > { %1213 = vmatmul.f32.gmra.mxu3 %v2380_v6  ;;  %1275 = vmatmul.f32.gmra.mxu0 %v2596_v30 }
  0x7f   : > { %1520 = vmatpush.msra.mxu0 %v973_v8  ;;  %1326 = vmatpush.msra.mxu1 %v924_v9 }
  0x80   : > { %1392 = vmatpush.msra.mxu2 %v939_v13  ;;  %1457 = vmatpush.msra.mxu3 %v955_v18 }
  0x81   : > { %1521 = vmatpush.msra.mxu0 %v972_v19  ;;  %1327 = vmatpush.msra.mxu1 %v923_v21 }
  0x83   : > { %1151 = vmatmul.f32.gmra.mxu2 %v2614_v38  ;;  %1522 = vmatpush.msra.mxu0 %v971_v33 }
  0x84   : > { %1086 = vmatmul.f32.gmra.mxu1 %v2596_v30 }
  0x86   : > { %1216 = vmatmul.f32.gmra.mxu3 %v2216_v17  ;;  %1278 = vmatmul.f32.gmra.mxu0 %v2618_v39 }
  0x8b   : > { %1154 = vmatmul.f32.gmra.mxu2 %v2636_v44 }
  0x8c   : > { %1089 = vmatmul.f32.gmra.mxu1 %v2618_v39 }
  0x8e   : > { %1219 = vmatmul.f32.gmra.mxu3 %v2259_v31  ;;  %1281 = vmatmul.f32.gmra.mxu0 %v2640_v45 }
  0x93   : > { %1157 = vmatmul.f32.gmra.mxu2 %v2658_v52 }
  0x94   : > { %1092 = vmatmul.f32.gmra.mxu1 %v2640_v45 }
  0x96   : > { %1222 = vmatmul.f32.gmra.mxu3 %v2316_v49  ;;  %1284 = vmatmul.f32.gmra.mxu0 %v2662_v53 }
  0x9b   : > { %1160 = vmatmul.f32.gmra.mxu2 %v2680_v59 }
  0x9c   : > { %1095 = vmatmul.f32.gmra.mxu1 %v2662_v53 }
  0x9e   : > { %1225 = vmatmul.f32.gmra.mxu3 %v2377_v5  ;;  %1287 = vmatmul.f32.gmra.mxu0 %v2684_v60 }
  0xa3   : > { %1163 = vmatmul.f32.gmra.mxu2 %v2702_v2 }
  0xa4   : > { %1098 = vmatmul.f32.gmra.mxu1 %v2684_v60 }
  0xa6   : > { %1228 = vmatmul.f32.gmra.mxu3 %v2225_v20  ;;  %1290 = vmatmul.f32.gmra.mxu0 %v2706_v3  ;;  %v2728_v20 = vld [vmem:[%s2207_s6 + $0x91] sm:$0xff] }
  0xab   : > { %1166 = vmatmul.f32.gmra.mxu2 %v2724_v10  ;;  %v2730_v11 = vpop.f32.mrf.mxu1 }
  0xac   : > { %1101 = vmatmul.f32.gmra.mxu1 %v2706_v3 }
  0xae   : > { %1231 = vmatmul.f32.gmra.mxu3 %v2275_v36  ;;  %1293 = vmatmul.f32.gmra.mxu0 %v2728_v20 }
  0xb1   : > { %v2751_v36 = vpop.f32.mrf.mxu2  ;;  %v1004_v28 = vpop.f32.mrf.mxu0 }
  0xb3   : > { %1169 = vmatmul.f32.gmra.mxu2 %v2749_v22  ;;  %v2757_v26 = vpop.f32.mrf.mxu3 }
  0xb4   : > { %1104 = vmatmul.f32.gmra.mxu1 %v2728_v20  ;;  %v2760_v27 = vpop.f32.mrf.mxu1 }
  0xb6   : > { %1234 = vmatmul.f32.gmra.mxu3 %v2337_v56  ;;  %1296 = vmatmul.f32.gmra.mxu0 %v2755_v25 }
  0xb9   : > { %v2770_v35 = vpop.f32.mrf.mxu2 }
  0xbb   : > { %1172 = vmatmul.f32.gmra.mxu2 %v2768_v34 }
  0xbc   : > { %1107 = vmatmul.f32.gmra.mxu1 %v2755_v25  ;;  %v2778_v56 = vpop.f32.mrf.mxu3 }
  0xbd   : > { %v2780_v40 = vpop.f32.mrf.mxu1 }
  0xbe   : > { %1237 = vmatmul.f32.gmra.mxu3 %v2398_v12  ;;  %1299 = vmatmul.f32.gmra.mxu0 %v2775_v37 }
  0xbf   : > { %v1007_v41 = vpop.f32.mrf.mxu0 }
  0xc2   : > { %v2792_v43 = vpop.f32.mrf.mxu2 }
  0xc3   : > { %1175 = vmatmul.f32.gmra.mxu2 %v2785_v42 }
  0xc4   : > { %1110 = vmatmul.f32.gmra.mxu1 %v2775_v37 }
  0xc6   : > { %1240 = vmatmul.f32.gmra.mxu3 %v2796_v46  ;;  %1302 = vmatmul.f32.gmra.mxu0 %v2799_v47  ;;  %v2804_v48 = vpop.f32.mrf.mxu3 }
  0xc7   : > { %v2806_v51 = vpop.f32.mrf.mxu1 }
  0xc9   : > { %v1010_v55 = vpop.f32.mrf.mxu0 }
  0xcb   : > { %1178 = vmatmul.f32.gmra.mxu2 %v2809_v54 }
  0xcc   : > { %1113 = vmatmul.f32.gmra.mxu1 %v2799_v47  ;;  %v2819_v61 = vpop.f32.mrf.mxu2 }
  0xce   : > { %1243 = vmatmul.f32.gmra.mxu3 %v2813_v57  ;;  %1305 = vmatmul.f32.gmra.mxu0 %v2816_v58 }
  0xd0   : > { %v2823_v62 = vpop.f32.mrf.mxu3 }
  0xd1   : > { %v1069_v0 = vpop.f32.mrf.mxu1 }
  0xd2   : > { %v1070_v7 = vadd.f32 %v1069_v0, %v1004_v28 }
  0xd3   : > { %v1013_v1 = vpop.f32.mrf.mxu0  ;;  %1393 = vmatmul.f32.vlgmr.msra.gmra.mxu2 %v2213_v16 }
  0xd4   : > { %1328 = vmatmul.f32.vlgmr.msra.gmra.mxu1 %v2513_v63 }
  0xd6   : > { %1308 = vmatmul.f32.gmra.mxu0 %v2827_v4  ;;  %1458 = vmatmul.f32.vlgmr.msra.gmra.mxu3 %v2553_v15  ;;  %v1134_v8 = vpop.f32.mrf.mxu2 }
  0xd7   : > { %v1135_v9 = vadd.f32 %v1134_v8, %v1070_v7 }
  0xd9   : > { %v1072_v13 = vpop.f32.mrf.mxu1  ;;  %v1199_v18 = vpop.f32.mrf.mxu3 }
  0xda   : > { %v2832_v19 = vadd.f32 %v1199_v18, %v1135_v9  ;;  %v1073_v16 = vadd.f32 %v1072_v13, %v1007_v41 }
  0xdb   : > { %v2834_v21 = vpop.f32.mrf.mxu0  ;;  %1396 = vmatmul.f32.gmra.mxu2 %v2262_v32 }
  0xdc   : > { %1331 = vmatmul.f32.gmra.mxu1 %v2549_v14 }
  0xde   : > { %1461 = vmatmul.f32.gmra.mxu3 %v2574_v24  ;;  %1523 = vmatmul.f32.vlgmr.msra.gmra.mxu0 %v2570_v23  ;;  %v1137_v63 = vpop.f32.mrf.mxu2 }
  0xdf   : > { %v1138_v28 = vadd.f32 %v1137_v63, %v1073_v16 }
  0xe1   : > { %v1075_v15 = vpop.f32.mrf.mxu1  ;;  %v1202_v33 = vpop.f32.mrf.mxu3 }
  0xe2   : > { %v2840_v0 = vadd.f32 %v1202_v33, %v1138_v28  ;;  %v1076_v32 = vadd.f32 %v1075_v15, %v1010_v55 }
  0xe3   : > { %v2842_v7 = vpop.f32.mrf.mxu0  ;;  %1399 = vmatmul.f32.gmra.mxu2 %v2319_v50 }
  0xe4   : > { %1334 = vmatmul.f32.gmra.mxu1 %v2570_v23 }
  0xe6   : > { %1464 = vmatmul.f32.gmra.mxu3 %v2596_v30  ;;  %1526 = vmatmul.f32.gmra.mxu0 %v2592_v29  ;;  %v1140_v14 = vpop.f32.mrf.mxu2 }
  0xe7   : > { %v1141_v24 = vadd.f32 %v1140_v14, %v1076_v32 }
  0xe9   : > { %v1078_v41 = vpop.f32.mrf.mxu1  ;;  %v1205_v8 = vpop.f32.mrf.mxu3 }
  0xea   : > { %v2848_v9 = vadd.f32 %v1205_v8, %v1141_v24  ;;  %v1079_v50 = vadd.f32 %v1078_v41, %v1013_v1 }
  0xeb   : > { %v2850_v13 = vpop.f32.mrf.mxu0  ;;  %1402 = vmatmul.f32.gmra.mxu2 %v2380_v6 }
  0xec   : > { %1337 = vmatmul.f32.gmra.mxu1 %v2592_v29 }
  0xee   : > { %1467 = vmatmul.f32.gmra.mxu3 %v2618_v39  ;;  %1529 = vmatmul.f32.gmra.mxu0 %v2614_v38  ;;  %v1143_v23 = vpop.f32.mrf.mxu2 }
  0xef   : > { %v1144_v30 = vadd.f32 %v1143_v23, %v1079_v50 }
  0xf1   : > { %v1081_v55 = vpop.f32.mrf.mxu1  ;;  %v1208_v18 = vpop.f32.mrf.mxu3 }
  0xf2   : > { %v2856_v16 = vadd.f32 %v1208_v18, %v1144_v30  ;;  %v1082_v6 = vadd.f32 %v1081_v55, %v2730_v11 }
  0xf3   : > { %v2858_v63 = vpop.f32.mrf.mxu0  ;;  %1405 = vmatmul.f32.gmra.mxu2 %v2216_v17 }
  0xf4   : > { %1340 = vmatmul.f32.gmra.mxu1 %v2614_v38 }
  0xf6   : > { %1470 = vmatmul.f32.gmra.mxu3 %v2640_v45  ;;  %1532 = vmatmul.f32.gmra.mxu0 %v2636_v44  ;;  %v1146_v29 = vpop.f32.mrf.mxu2 }
  0xf7   : > { %v1147_v39 = vadd.f32 %v1146_v29, %v1082_v6 }
  0xf9   : > { %v1084_v1 = vpop.f32.mrf.mxu1  ;;  %v1211_v28 = vpop.f32.mrf.mxu3 }
  0xfa   : > { %v2865_v15 = vadd.f32 %v1211_v28, %v1147_v39  ;;  %v1085_v17 = vadd.f32 %v1084_v1, %v2760_v27 }
  0xfb   : > { %v2867_v33 = vpop.f32.mrf.mxu0  ;;  %1408 = vmatmul.f32.gmra.mxu2 %v2259_v31 }
  0xfc   : > { %1343 = vmatmul.f32.gmra.mxu1 %v2636_v44 }
  0xfe   : > { %1473 = vmatmul.f32.gmra.mxu3 %v2662_v53  ;;  %1535 = vmatmul.f32.gmra.mxu0 %v2658_v52  ;;  %v1149_v38 = vpop.f32.mrf.mxu2 }
  0xff   : > { %v1150_v45 = vadd.f32 %v1149_v38, %v1085_v17  ;;  %v1918_v17 = vld [vmem:[%s2207_s6 + $0xa8] sm:$0xff] }
 0x101   : > { %v1087_v11 = vpop.f32.mrf.mxu1  ;;  %v1214_v32 = vpop.f32.mrf.mxu3 }
 0x102   : > { %v2874_v14 = vadd.f32 %v1214_v32, %v1150_v45  ;;  %v1088_v31 = vadd.f32 %v1087_v11, %v2780_v40  ;;  %v1916_v40 = vld [vmem:[%s2207_s6 + $0x90] sm:$0xff] }
 0x103   : > { %v2876_v24 = vpop.f32.mrf.mxu0  ;;  %1411 = vmatmul.f32.gmra.mxu2 %v2316_v49 }
 0x104   : > { %1346 = vmatmul.f32.gmra.mxu1 %v2658_v52 }
 0x106   : > { %1476 = vmatmul.f32.gmra.mxu3 %v2684_v60  ;;  %1538 = vmatmul.f32.gmra.mxu0 %v2680_v59  ;;  %v1152_v44 = vpop.f32.mrf.mxu2 }
 0x107   : > { %v1153_v53 = vadd.f32 %v1152_v44, %v1088_v31 }
 0x109   : > { %v1090_v27 = vpop.f32.mrf.mxu1  ;;  %v1217_v41 = vpop.f32.mrf.mxu3 }
 0x10a   : > { %v2883_v8 = vadd.f32 %v1217_v41, %v1153_v53  ;;  %v1091_v49 = vadd.f32 %v1090_v27, %v2806_v51  ;;  %v1917_v51 = vld [vmem:[%s2207_s6 + $0x98] sm:$0xff]  ;;  %s386_s6 = sadd.s32 %s1997_s8, %s2183_s28  ;;  %s1861_s28 = sshll.u32 %s2063_s18, 4 }
 0x10b   : > { %v2885_v50 = vpop.f32.mrf.mxu0  ;;  %1414 = vmatmul.f32.gmra.mxu2 %v2377_v5  ;;  %s1860_s7 = sshll.u32 %s386_s6, 3  ;;  %p394_p9 = scmp.lt.s32.totalorder %s1861_s28, 31 }
 0x10c   : > { %1349 = vmatmul.f32.gmra.mxu1 %v2680_v59  ;;  %s2940_s11 = scalar_lea.vmem %s3091_s2, %s1860_s7  ;;  %s3058_s18 = scalar_lea.vmem %s3094_s5, %s1865_s27 }
 0x10d   : > { %s3110_s28 = smov (!%p394_p9, %s1861_s28), 31 }
 0x10e   : > { %1479 = vmatmul.f32.gmra.mxu3 %v2706_v3  ;;  %1541 = vmatmul.f32.gmra.mxu0 %v2702_v2  ;;  %v1155_v52 = vpop.f32.mrf.mxu2  ;;  %s397_s13 = sadd.s32 %s1862_s12, %s3110_s28 }
 0x10f   : > { %v1156_v60 = vadd.f32 %v1155_v52, %v1091_v49  ;;  %s1863_s14 = sshll.u32 %s397_s13, 3 }
 0x110   : > { %s2967_s17 = scalar_lea.vmem %s3093_s4, %s1863_s14 }
 0x111   : > { %v1093_v23 = vpop.f32.mrf.mxu1  ;;  %v1220_v30 = vpop.f32.mrf.mxu3 }
 0x112   : > { %v2893_v55 = vadd.f32 %v1220_v30, %v1156_v60  ;;  %v1094_v5 = vadd.f32 %v1093_v23, %v2751_v36 }
 0x113   : > { %v2895_v18 = vpop.f32.mrf.mxu0  ;;  %1417 = vmatmul.f32.gmra.mxu2 %v1916_v40 }
 0x114   : > { %1352 = vmatmul.f32.gmra.mxu1 %v2702_v2 }
 0x116   : > { %1482 = vmatmul.f32.gmra.mxu3 %v2728_v20  ;;  %1544 = vmatmul.f32.gmra.mxu0 %v2724_v10  ;;  %v1158_v59 = vpop.f32.mrf.mxu2 }
 0x117   : > { %v1159_v3 = vadd.f32 %v1158_v59, %v1094_v5 }
 0x119   : > { %v1096_v6 = vpop.f32.mrf.mxu1  ;;  %v1223_v29 = vpop.f32.mrf.mxu3 }
 0x11a   : > { %v1224_v39 = vadd.f32 %v1223_v29, %v1159_v3  ;;  %v1097_v2 = vadd.f32 %v1096_v6, %v2770_v35  ;;  %v691_v3 = vld [vmem:[%s2790_s29 + $0x2] sm:$0xff] }
 0x11b   : > { %v1288_v1 = vpop.f32.mrf.mxu0  ;;  %1420 = vmatmul.f32.gmra.mxu2 %v1917_v51 }
 0x11c   : > { %v2902_v28 = vadd.f32 %v1288_v1, %v1224_v39  ;;  %1355 = vmatmul.f32.gmra.mxu1 %v2724_v10  ;;  %v692_v1 = vld [vmem:[%s2790_s29 + $0xa] sm:$0xff] }
 0x11e   : > { %1485 = vmatmul.f32.gmra.mxu3 %v2755_v25  ;;  %1547 = vmatmul.f32.gmra.mxu0 %v2749_v22  ;;  %v1161_v20 = vpop.f32.mrf.mxu2 }
 0x11f   : > { %v1162_v36 = vadd.f32 %v1161_v20, %v1097_v2 }
 0x121   : > { %v1099_v38 = vpop.f32.mrf.mxu1  ;;  %v1226_v45 = vpop.f32.mrf.mxu3 }
 0x122   : > { %v1227_v11 = vadd.f32 %v1226_v45, %v1162_v36  ;;  %v1100_v10 = vadd.f32 %v1099_v38, %v2792_v43 }
 0x123   : > { %v1291_v32 = vpop.f32.mrf.mxu0  ;;  %1423 = vmatmul.f32.gmra.mxu2 %v1918_v17  ;;  %v632_v17 = vld [vmem:[%s2940_s11 + $0x8] sm:$0xff] }
 0x124   : > { %v2909_v31 = vadd.f32 %v1291_v32, %v1227_v11  ;;  %1358 = vmatmul.f32.gmra.mxu1 %v2749_v22 }
 0x126   : > { %1488 = vmatmul.f32.gmra.mxu3 %v2775_v37  ;;  %1550 = vmatmul.f32.gmra.mxu0 %v2768_v34  ;;  %v1164_v25 = vpop.f32.mrf.mxu2 }
 0x127   : > { %v1165_v35 = vadd.f32 %v1164_v25, %v1100_v10  ;;  %v664_v10 = vld [vmem:[%s2940_s11 + $0x9] sm:$0xff] }
 0x128   : > { %v695_v25 = vld [vmem:[%s2940_s11 + $0x2] sm:$0xff] }
 0x129   : > { %v1102_v44 = vpop.f32.mrf.mxu1  ;;  %v1229_v53 = vpop.f32.mrf.mxu3 }
 0x12a   : > { %v1230_v27 = vadd.f32 %v1229_v53, %v1165_v35  ;;  %v1103_v22 = vadd.f32 %v1102_v44, %v2819_v61 }
 0x12b   : > { %v1294_v41 = vpop.f32.mrf.mxu0  ;;  %1426 = vmatmul.f32.gmra.mxu2 %v2398_v12 }
 0x12c   : > { %v2917_v49 = vadd.f32 %v1294_v41, %v1230_v27  ;;  %1361 = vmatmul.f32.gmra.mxu1 %v2768_v34 }
 0x12e   : > { %1491 = vmatmul.f32.gmra.mxu3 %v2799_v47  ;;  %1553 = vmatmul.f32.gmra.mxu0 %v2785_v42  ;;  %v1167_v37 = vpop.f32.mrf.mxu2 }
 0x12f   : > { %v1168_v43 = vadd.f32 %v1167_v37, %v1103_v22  ;;  %v1265_v37 = vadd.f32 %v2834_v21, %v2832_v19 }
 0x131   : > { %v1105_v52 = vpop.f32.mrf.mxu1  ;;  %v1232_v60 = vpop.f32.mrf.mxu3 }
 0x132   : > { %v1233_v40 = vadd.f32 %v1232_v60, %v1168_v43  ;;  %v1106_v34 = vadd.f32 %v1105_v52, %v2757_v26  ;;  %v696_v52 = vld [vmem:[%s2940_s11 + $0xa] sm:$0xff] }
 0x133   : > { %v1297_v23 = vpop.f32.mrf.mxu0  ;;  %1429 = vmatmul.f32.gmra.mxu2 %v2796_v46 }
 0x134   : > { %v2924_v12 = vadd.f32 %v1297_v23, %v1233_v40  ;;  %1364 = vmatmul.f32.gmra.mxu1 %v2785_v42 }
 0x136   : > { %1494 = vmatmul.f32.gmra.mxu3 %v2816_v58  ;;  %1556 = vmatmul.f32.gmra.mxu0 %v2809_v54  ;;  %v1170_v47 = vpop.f32.mrf.mxu2  ;;  %v631_v58 = vld [vmem:[%s2940_s11] sm:$0xff] }
 0x137   : > { %v1171_v61 = vadd.f32 %v1170_v47, %v1106_v34 }
 0x139   : > { %v1108_v30 = vpop.f32.mrf.mxu1  ;;  %v1235_v5 = vpop.f32.mrf.mxu3 }
 0x13a   : > { %v1236_v59 = vadd.f32 %v1235_v5, %v1171_v61  ;;  %v1109_v26 = vadd.f32 %v1108_v30, %v2778_v56  ;;  %v663_v56 = vld [vmem:[%s2940_s11 + $0x1] sm:$0xff]  ;;  %v1268_v30 = vadd.f32 %v2842_v7, %v2840_v0  ;;  %v1271_v0 = vadd.f32 %v2850_v13, %v2848_v9 }
 0x13b   : > { %v1300_v46 = vpop.f32.mrf.mxu0  ;;  %1432 = vmatmul.f32.gmra.mxu2 %v2813_v57 }
 0x13c   : > { %v2933_v51 = vadd.f32 %v1300_v46, %v1236_v59  ;;  %1367 = vmatmul.f32.gmra.mxu1 %v2809_v54 }
 0x13e   : > { %1497 = vmatmul.f32.gmra.mxu3 %v2827_v4  ;;  %1559 = vmatmul.f32.gmra.mxu0 %v691_v3  ;;  %v1173_v42 = vpop.f32.mrf.mxu2 }
 0x13f   : > { %v1174_v57 = vadd.f32 %v1173_v42, %v1109_v26 }
 0x141   : > { %v1111_v6 = vpop.f32.mrf.mxu1  ;;  %v1238_v29 = vpop.f32.mrf.mxu3 }
 0x142   : > { %v1239_v39 = vadd.f32 %v1238_v29, %v1174_v57  ;;  %v1112_v4 = vadd.f32 %v1111_v6, %v2804_v48 }
 0x143   : > { %v1303_v54 = vpop.f32.mrf.mxu0  ;;  %1435 = vmatmul.f32.gmra.mxu2 %v631_v58 }
 0x144   : > { %v2946_v2 = vadd.f32 %v1303_v54, %v1239_v39  ;;  %1370 = vmatmul.f32.gmra.mxu1 %v691_v3 }
 0x146   : > { %1500 = vmatmul.f32.gmra.mxu3 %v663_v56  ;;  %1562 = vmatmul.f32.gmra.mxu0 %v692_v1  ;;  %v1176_v20 = vpop.f32.mrf.mxu2 }
 0x147   : > { %v1177_v36 = vadd.f32 %v1176_v20, %v1112_v4 }
 0x149   : > { %v1114_v38 = vpop.f32.mrf.mxu1  ;;  %v1241_v45 = vpop.f32.mrf.mxu3 }
 0x14a   : > { %v1242_v11 = vadd.f32 %v1241_v45, %v1177_v36  ;;  %v1115_v48 = vadd.f32 %v1114_v38, %v2823_v62 }
 0x14b   : > { %v1306_v32 = vpop.f32.mrf.mxu0  ;;  %1438 = vmatmul.f32.gmra.mxu2 %v632_v17 }
 0x14c   : > { %v2953_v35 = vadd.f32 %v1306_v32, %v1242_v11  ;;  %1373 = vmatmul.f32.gmra.mxu1 %v692_v1  ;;  %v1274_v1 = vadd.f32 %v2858_v63, %v2856_v16  ;;  %v1277_v11 = vadd.f32 %v2867_v33, %v2865_v15 }
 0x14e   : > { %1503 = vmatmul.f32.gmra.mxu3 %v664_v10  ;;  %1565 = vmatmul.f32.gmra.mxu0 %v695_v25  ;;  %v1179_v44 = vpop.f32.mrf.mxu2 }
 0x14f   : > { %v1180_v53 = vadd.f32 %v1179_v44, %v1115_v48 }
 0x151   : > { %v1244_v27 = vpop.f32.mrf.mxu3  ;;  %v1329_v41 = vpop.f32.mrf.mxu1 }
 0x152   : > { %v1245_v22 = vadd.f32 %v1244_v27, %v1180_v53  ;;  %v1330_v40 = vadd.f32 %v1329_v41, %v1265_v37  ;;  %v1280_v27 = vadd.f32 %v2876_v24, %v2874_v14 }
 0x153   : > { %v1309_v43 = vpop.f32.mrf.mxu0 }
 0x154   : > { %v2960_v60 = vadd.f32 %v1309_v43, %v1245_v22 }
 0x156   : > { %1568 = vmatmul.f32.gmra.mxu0 %v696_v52  ;;  %v1394_v62 = vpop.f32.mrf.mxu2 }
 0x157   : > { %v1395_v23 = vadd.f32 %v1394_v62, %v1330_v40  ;;  %v1283_v62 = vadd.f32 %v2885_v50, %v2883_v8 }
 0x159   : > { %v1332_v34 = vpop.f32.mrf.mxu1  ;;  %v1459_v47 = vpop.f32.mrf.mxu3 }
 0x15a   : > { %v1460_v61 = vadd.f32 %v1459_v47, %v1395_v23  ;;  %v1333_v5 = vadd.f32 %v1332_v34, %v1268_v30 }
 0x15b   : > { %v1524_v19 = vpop.f32.mrf.mxu0 }
 0x15c   : > { %v2969_v21 = vadd.f32 %v1524_v19, %v1460_v61 }
 0x15e   : > { %1572 = vst [vmem:[%s2967_s17] sm:$0xff] %v2969_v21  ;;  %v1397_v59 = vpop.f32.mrf.mxu2 }
 0x15f   : > { %v1398_v46 = vadd.f32 %v1397_v59, %v1333_v5  ;;  %v1286_v5 = vadd.f32 %v2895_v18, %v2893_v55 }
 0x161   : > { %v1335_v3 = vpop.f32.mrf.mxu1  ;;  %v1462_v26 = vpop.f32.mrf.mxu3 }
 0x162   : > { %v1463_v42 = vadd.f32 %v1462_v26, %v1398_v46  ;;  %v1336_v58 = vadd.f32 %v1335_v3, %v1271_v0 }
 0x163   : > { %v1527_v7 = vpop.f32.mrf.mxu0 }
 0x164   : > { %v2975_v57 = vadd.f32 %v1527_v7, %v1463_v42 }
 0x166   : > { %1573 = vst [vmem:[%s2967_s17 + $0x8] sm:$0xff] %v2975_v57  ;;  %v1400_v6 = vpop.f32.mrf.mxu2 }
 0x167   : > { %v1401_v29 = vadd.f32 %v1400_v6, %v1336_v58 }
 0x169   : > { %v1338_v39 = vpop.f32.mrf.mxu1  ;;  %v1465_v54 = vpop.f32.mrf.mxu3 }
 0x16a   : > { %v1466_v56 = vadd.f32 %v1465_v54, %v1401_v29  ;;  %v1339_v36 = vadd.f32 %v1338_v39, %v1274_v1 }
 0x16b   : > { %v1530_v4 = vpop.f32.mrf.mxu0 }
 0x16c   : > { %v2981_v20 = vadd.f32 %v1530_v4, %v1466_v56 }
 0x16e   : > { %1574 = vst [vmem:[%s2967_s17 + $0x10] sm:$0xff] %v2981_v20  ;;  %v1403_v9 = vpop.f32.mrf.mxu2 }
 0x16f   : > { %v1404_v13 = vadd.f32 %v1403_v9, %v1339_v36 }
 0x171   : > { %v1341_v17 = vpop.f32.mrf.mxu1  ;;  %v1468_v38 = vpop.f32.mrf.mxu3 }
 0x172   : > { %v1469_v45 = vadd.f32 %v1468_v38, %v1404_v13  ;;  %v1342_v25 = vadd.f32 %v1341_v17, %v1277_v11 }
 0x173   : > { %v1533_v32 = vpop.f32.mrf.mxu0 }
 0x174   : > { %v2987_v10 = vadd.f32 %v1533_v32, %v1469_v45 }
 0x176   : > { %1575 = vst [vmem:[%s2967_s17 + $0x18] sm:$0xff] %v2987_v10  ;;  %v1406_v16 = vpop.f32.mrf.mxu2 }
 0x177   : > { %v1407_v63 = vadd.f32 %v1406_v16, %v1342_v25 }
 0x179   : > { %v1344_v48 = vpop.f32.mrf.mxu1  ;;  %v1471_v44 = vpop.f32.mrf.mxu3 }
 0x17a   : > { %v1472_v53 = vadd.f32 %v1471_v44, %v1407_v63  ;;  %v1345_v37 = vadd.f32 %v1344_v48, %v1280_v27 }
 0x17b   : > { %v1536_v41 = vpop.f32.mrf.mxu0 }
 0x17c   : > { %v2993_v22 = vadd.f32 %v1536_v41, %v1472_v53 }
 0x17e   : > { %1576 = vst [vmem:[%s2967_s17 + $0x20] sm:$0xff] %v2993_v22  ;;  %v1409_v15 = vpop.f32.mrf.mxu2 }
 0x17f   : > { %v1410_v33 = vadd.f32 %v1409_v15, %v1345_v37 }
 0x181   : > { %v1347_v43 = vpop.f32.mrf.mxu1  ;;  %v1474_v52 = vpop.f32.mrf.mxu3 }
 0x182   : > { %v1475_v40 = vadd.f32 %v1474_v52, %v1410_v33  ;;  %v1348_v47 = vadd.f32 %v1347_v43, %v1283_v62 }
 0x183   : > { %v1539_v23 = vpop.f32.mrf.mxu0 }
 0x184   : > { %v2999_v34 = vadd.f32 %v1539_v23, %v1475_v40 }
 0x186   : > { %1577 = vst [vmem:[%s2967_s17 + $0x28] sm:$0xff] %v2999_v34  ;;  %v1412_v14 = vpop.f32.mrf.mxu2 }
 0x187   : > { %v1413_v24 = vadd.f32 %v1412_v14, %v1348_v47 }
 0x189   : > { %v1350_v61 = vpop.f32.mrf.mxu1  ;;  %v1477_v30 = vpop.f32.mrf.mxu3 }
 0x18a   : > { %v1478_v19 = vadd.f32 %v1477_v30, %v1413_v24  ;;  %v1351_v3 = vadd.f32 %v1350_v61, %v1286_v5 }
 0x18b   : > { %v1542_v59 = vpop.f32.mrf.mxu0 }
 0x18c   : > { %v3005_v46 = vadd.f32 %v1542_v59, %v1478_v19 }
 0x18e   : > { %1578 = vst [vmem:[%s2967_s17 + $0x30] sm:$0xff] %v3005_v46  ;;  %v1415_v8 = vpop.f32.mrf.mxu2 }
 0x18f   : > { %v1416_v50 = vadd.f32 %v1415_v8, %v1351_v3 }
 0x191   : > { %v1353_v26 = vpop.f32.mrf.mxu1  ;;  %v1480_v42 = vpop.f32.mrf.mxu3 }
 0x192   : > { %v1481_v0 = vadd.f32 %v1480_v42, %v1416_v50  ;;  %v1354_v6 = vadd.f32 %v1353_v26, %v2902_v28  ;;  %v1588_v28 = vadd.f32 %v2975_v57, %v2969_v21 }
 0x193   : > { %v1545_v7 = vpop.f32.mrf.mxu0 }
 0x194   : > { %v3009_v58 = vadd.f32 %v1545_v7, %v1481_v0  ;;  %v1589_v11 = vadd.f32 %v1588_v28, %v2981_v20 }
 0x196   : > { %1579 = vst [vmem:[%s2967_s17 + $0x38] sm:$0xff] %v3009_v58  ;;  %v1418_v55 = vpop.f32.mrf.mxu2 }
 0x197   : > { %v1419_v18 = vadd.f32 %v1418_v55, %v1354_v6 }
 0x199   : > { %v1356_v29 = vpop.f32.mrf.mxu1  ;;  %v1483_v39 = vpop.f32.mrf.mxu3 }
 0x19a   : > { %v1484_v54 = vadd.f32 %v1483_v39, %v1419_v18  ;;  %v1357_v4 = vadd.f32 %v1356_v29, %v2909_v31  ;;  %v1590_v31 = vadd.f32 %v1589_v11, %v2987_v10 }
 0x19b   : > { %v1548_v56 = vpop.f32.mrf.mxu0 }
 0x19c   : > { %v3014_v1 = vadd.f32 %v1548_v56, %v1484_v54  ;;  %v1591_v48 = vadd.f32 %v1590_v31, %v2993_v22 }
 0x19e   : > { %1580 = vst [vmem:[%s2967_s17 + $0x40] sm:$0xff] %v3014_v1  ;;  %v1421_v36 = vpop.f32.mrf.mxu2  ;;  %v1592_v27 = vadd.f32 %v1591_v48, %v2999_v34 }
 0x19f   : > { %v1422_v9 = vadd.f32 %v1421_v36, %v1357_v4 }
 0x1a0   : > { %v1593_v15 = vadd.f32 %v1592_v27, %v3005_v46 }
 0x1a1   : > { %v1359_v13 = vpop.f32.mrf.mxu1  ;;  %v1486_v17 = vpop.f32.mrf.mxu3 }
 0x1a2   : > { %v1487_v38 = vadd.f32 %v1486_v17, %v1422_v9  ;;  %v1360_v25 = vadd.f32 %v1359_v13, %v2917_v49  ;;  %v1594_v43 = vadd.f32 %v1593_v15, %v3009_v58  ;;  %v2081_v17 = vmov 128.0  }
 0x1a3   : > { %v1551_v45 = vpop.f32.mrf.mxu0  ;;  %2039 = vrcp.f32 %v2081_v17 }
 0x1a4   : > { %v3022_v32 = vadd.f32 %v1551_v45, %v1487_v38  ;;  %v1595_v62 = vadd.f32 %v1594_v43, %v3014_v1 }
 0x1a6   : > { %1581 = vst [vmem:[%s2967_s17 + $0x48] sm:$0xff] %v3022_v32  ;;  %v1424_v16 = vpop.f32.mrf.mxu2  ;;  %v1596_v14 = vadd.f32 %v1595_v62, %v3022_v32 }
 0x1a7   : > { %v1425_v63 = vadd.f32 %v1424_v16, %v1360_v25 }
 0x1a9   : > { %v1362_v44 = vpop.f32.mrf.mxu1  ;;  %v1489_v53 = vpop.f32.mrf.mxu3 }
 0x1aa   : > { %v1490_v41 = vadd.f32 %v1489_v53, %v1425_v63  ;;  %v1363_v49 = vadd.f32 %v1362_v44, %v2924_v12  ;;  %v2040_v31 = vpop.eup %2039 }
 0x1ab   : > { %v1554_v37 = vpop.f32.mrf.mxu0  ;;  %v1610_v44 = vmul.f32 128.0, %v2040_v31  ;;  %vm1614_vm0 = vweird.f32 %v2040_v31 }
 0x1ac   : > { %v3031_v33 = vadd.f32 %v1554_v37, %v1490_v41 }
 0x1ad   : > { %v1611_v37 = vsub.f32 1.0, %v1610_v44 }
 0x1ae   : > { %1582 = vst [vmem:[%s2967_s17 + $0x50] sm:$0xff] %v3031_v33  ;;  %v1427_v52 = vpop.f32.mrf.mxu2  ;;  %v1597_v30 = vadd.f32 %v1596_v14, %v3031_v33 }
 0x1af   : > { %v1428_v40 = vadd.f32 %v1427_v52, %v1363_v49  ;;  %v1612_v43 = vmul.f32 %v2040_v31, %v1611_v37 }
 0x1b1   : > { %v1365_v23 = vpop.f32.mrf.mxu1  ;;  %v1492_v47 = vpop.f32.mrf.mxu3 }
 0x1b2   : > { %v1493_v24 = vadd.f32 %v1492_v47, %v1428_v40  ;;  %v1366_v12 = vadd.f32 %v1365_v23, %v2933_v51  ;;  %v1613_v40 = vadd.f32 %v2040_v31, %v1612_v43 }
 0x1b3   : > { %v1557_v61 = vpop.f32.mrf.mxu0 }
 0x1b4   : > { %v3040_v19 = vadd.f32 %v1557_v61, %v1493_v24  ;;  %v1615_v47 = vsel %vm1614_vm0, %v2040_v31, %v1613_v40 }
 0x1b6   : > { %1583 = vst [vmem:[%s2967_s17 + $0x58] sm:$0xff] %v3040_v19  ;;  %v1598_v5 = vadd.f32 %v1597_v30, %v3040_v19  ;;  %v1430_v59 = vpop.f32.mrf.mxu2 }
 0x1b7   : > { %v1431_v3 = vadd.f32 %v1430_v59, %v1366_v12 }
 0x1b9   : > { %v1368_v8 = vpop.f32.mrf.mxu1  ;;  %v1495_v50 = vpop.f32.mrf.mxu3 }
 0x1ba   : > { %v1496_v26 = vadd.f32 %v1495_v50, %v1431_v3  ;;  %v1369_v7 = vadd.f32 %v1368_v8, %v2946_v2 }
 0x1bb   : > { %v1560_v42 = vpop.f32.mrf.mxu0 }
 0x1bc   : > { %v1561_v0 = vadd.f32 %v1560_v42, %v1496_v26 }
 0x1be   : > { %1584 = vst [vmem:[%s2967_s17 + $0x60] sm:$0xff] %v1561_v0  ;;  %v1599_v6 = vadd.f32 %v1598_v5, %v1561_v0  ;;  %v1433_v55 = vpop.f32.mrf.mxu2 }
 0x1bf   : > { %v1434_v18 = vadd.f32 %v1433_v55, %v1369_v7 }
 0x1c1   : > { %v1371_v29 = vpop.f32.mrf.mxu1  ;;  %v1498_v51 = vpop.f32.mrf.mxu3 }
 0x1c2   : > { %v1499_v39 = vadd.f32 %v1498_v51, %v1434_v18  ;;  %v1372_v4 = vadd.f32 %v1371_v29, %v2953_v35 }
 0x1c3   : > { %v1563_v54 = vpop.f32.mrf.mxu0 }
 0x1c4   : > { %v1564_v56 = vadd.f32 %v1563_v54, %v1499_v39 }
 0x1c6   : > { %1585 = vst [vmem:[%s2967_s17 + $0x68] sm:$0xff] %v1564_v56  ;;  %v1600_v36 = vadd.f32 %v1599_v6, %v1564_v56  ;;  %v1436_v9 = vpop.f32.mrf.mxu2 }
 0x1c7   : > { %v1437_v13 = vadd.f32 %v1436_v9, %v1372_v4 }
 0x1c9   : > { %v1501_v2 = vpop.f32.mrf.mxu3  ;;  %v1374_v28 = vpop.f32.mrf.mxu1 }
 0x1ca   : > { %v1502_v38 = vadd.f32 %v1501_v2, %v1437_v13  ;;  %v1375_v25 = vadd.f32 %v1374_v28, %v2960_v60 }
 0x1cb   : > { %v1566_v45 = vpop.f32.mrf.mxu0 }
 0x1cc   : > { %v1567_v11 = vadd.f32 %v1566_v45, %v1502_v38 }
 0x1ce   : > { %1586 = vst [vmem:[%s2967_s17 + $0x70] sm:$0xff] %v1567_v11  ;;  %v1601_v16 = vadd.f32 %v1600_v36, %v1567_v11  ;;  %v1439_v35 = vpop.f32.mrf.mxu2 }
 0x1cf   : > { %v1440_v63 = vadd.f32 %v1439_v35, %v1375_v25 }
 0x1d1   : > { %v1504_v48 = vpop.f32.mrf.mxu3 }
 0x1d2   : > { %v1505_v53 = vadd.f32 %v1504_v48, %v1440_v63 }
 0x1d3   : > { %v1569_v27 = vpop.f32.mrf.mxu0 }
 0x1d4   : > { %v1570_v41 = vadd.f32 %v1569_v27, %v1505_v53 }
 0x1d6   : > { %1587 = vst [vmem:[%s2967_s17 + $0x78] sm:$0xff] %v1570_v41  ;;  %v1602_v15 = vadd.f32 %v1601_v16, %v1570_v41 }
 0x1d8   : > { %v1603_v49 = vrot.slane %v1602_v15, 4 }
 0x1da   : > { %v1604_v60 = vadd.f32 %v1603_v49, %v1602_v15 }
 0x1dc   : > { %v1605_v52 = vrot.slane %v1604_v60, 2 }
 0x1de   : > { %v1606_v62 = vadd.f32 %v1605_v52, %v1604_v60 }
 0x1e0   : > { %v1607_v23 = vrot.slane %v1606_v62, 1 }
 0x1e2   : > { %v1608_v14 = vadd.f32 %v1607_v23, %v1606_v62 }
 0x1e4   : > { %v1616_v24 = vmul.f32 %v1615_v47, %v1608_v14  ;;  %1670 = vst [vmem:[%s3058_s18] sm:$0x1] %v1608_v14 }
 0x1e6   : > { %v1617_v61 = vsub.f32 %v2969_v21, %v1616_v24  ;;  %v1618_v30 = vsub.f32 %v2975_v57, %v1616_v24  ;;  %v1627_v12 = vsub.f32 %v3031_v33, %v1616_v24  ;;  %v1628_v5 = vsub.f32 %v3040_v19, %v1616_v24 }
 0x1e7   : > { %v1629_v59 = vsub.f32 %v1561_v0, %v1616_v24  ;;  %v1630_v3 = vsub.f32 %v1564_v56, %v1616_v24  ;;  %v1631_v8 = vsub.f32 %v1567_v11, %v1616_v24  ;;  %v1632_v50 = vsub.f32 %v1570_v41, %v1616_v24 }
 0x1e8   : > { %v1619_v26 = vsub.f32 %v2981_v20, %v1616_v24  ;;  %v1633_v42 = vmul.f32 %v1617_v61, %v1617_v61  ;;  %v1634_v7 = vmul.f32 %v1618_v30, %v1618_v30  ;;  %v1620_v6 = vsub.f32 %v2987_v10, %v1616_v24 }
 0x1e9   : > { %v1621_v55 = vsub.f32 %v2993_v22, %v1616_v24  ;;  %v1622_v57 = vsub.f32 %v2999_v34, %v1616_v24  ;;  %v1623_v19 = vsub.f32 %v3005_v46, %v1616_v24  ;;  %v1624_v39 = vsub.f32 %v3009_v58, %v1616_v24 }
 0x1ea   : > { %v1635_v18 = vmul.f32 %v1619_v26, %v1619_v26  ;;  %v1649_v21 = vadd.f32 %v1634_v7, %v1633_v42  ;;  %v1636_v29 = vmul.f32 %v1620_v6, %v1620_v6  ;;  %v1625_v56 = vsub.f32 %v3014_v1, %v1616_v24 }
 0x1eb   : > { %v1637_v0 = vmul.f32 %v1621_v55, %v1621_v55  ;;  %v1638_v54 = vmul.f32 %v1622_v57, %v1622_v57  ;;  %v1639_v4 = vmul.f32 %v1623_v19, %v1623_v19  ;;  %v1626_v22 = vsub.f32 %v3022_v32, %v1616_v24 }
 0x1ec   : > { %v1650_v33 = vadd.f32 %v1649_v21, %v1635_v18  ;;  %v1640_v36 = vmul.f32 %v1624_v39, %v1624_v39  ;;  %v1641_v13 = vmul.f32 %v1625_v56, %v1625_v56  ;;  %v1643_v28 = vmul.f32 %v1627_v12, %v1627_v12 }
 0x1ed   : > { %v1642_v17 = vmul.f32 %v1626_v22, %v1626_v22  ;;  %v1644_v38 = vmul.f32 %v1628_v5, %v1628_v5  ;;  %v1645_v58 = vmul.f32 %v1629_v59, %v1629_v59  ;;  %v1646_v25 = vmul.f32 %v1630_v3, %v1630_v3 }
 0x1ee   : > { %v1651_v51 = vadd.f32 %v1650_v33, %v1636_v29  ;;  %v1647_v1 = vmul.f32 %v1631_v8, %v1631_v8  ;;  %v1648_v35 = vmul.f32 %v1632_v50, %v1632_v50 }
 0x1f0   : > { %v1652_v20 = vadd.f32 %v1651_v51, %v1637_v0 }
 0x1f2   : > { %v1653_v10 = vadd.f32 %v1652_v20, %v1638_v54 }
 0x1f4   : > { %v1654_v9 = vadd.f32 %v1653_v10, %v1639_v4 }
 0x1f6   : > { %v1655_v34 = vadd.f32 %v1654_v9, %v1640_v36 }
 0x1f8   : > { %v1656_v2 = vadd.f32 %v1655_v34, %v1641_v13 }
 0x1fa   : > { %v1657_v46 = vadd.f32 %v1656_v2, %v1642_v17 }
 0x1fc   : > { %v1658_v45 = vadd.f32 %v1657_v46, %v1643_v28 }
 0x1fe   : > { %v1659_v11 = vadd.f32 %v1658_v45, %v1644_v38 }
 0x200   : > { %v1660_v31 = vadd.f32 %v1659_v11, %v1645_v58 }
 0x202   : > { %v1661_v16 = vadd.f32 %v1660_v31, %v1646_v25 }
 0x204   : > { %v1662_v63 = vadd.f32 %v1661_v16, %v1647_v1 }
 0x206   : > { %v1663_v32 = vadd.f32 %v1662_v63, %v1648_v35 }
 0x208   : > { %v1664_v48 = vrot.slane %v1663_v32, 4 }
 0x20a   : > { %v1665_v44 = vadd.f32 %v1664_v48, %v1663_v32 }
 0x20c   : > { %v1666_v53 = vrot.slane %v1665_v44, 2 }
 0x20e   : > { %v1667_v27 = vadd.f32 %v1666_v53, %v1665_v44 }
 0x210   : > { %v1668_v41 = vrot.slane %v1667_v27, 1 }
 0x212   : > { %v1669_v37 = vadd.f32 %v1668_v41, %v1667_v27 }
 0x214   : > { %1671 = vst [vmem:[%s3058_s18 + $0x1] sm:$0x1] %v1669_v37 }
 0x215 PF: > { %s16_s22 = sadd.s32 1, %s2079_s22   ;;  %s3095_s18 = smov %s2071_s20 }
 0x216   : > { %p13_p11 = scmp.ge.s32.totalorder %s16_s22, 6   ;;  %s3096_s19 = smov %s2075_s21 }
 0x217   : > { %s3097_s20 = smov %s3100_s23  ;;  %s3098_s21 = smov %s3104_s24 }
 0x218   :  { %15 = sbr.rel (!%p13_p11) target bundleno = 3 (0x3), region = 86 }

</bundles_post_ra>
